<compile_context>
chip_gen: v5e
topology: v5e:2x2
jax: 0.10.0
libtpu: 0.0.40
codegen_flags: <defaults>
</compile_context>

<pallas_src>
import functools

import jax
import jax.numpy as jnp
from jax.experimental import pallas as pl
from jax.experimental.pallas import tpu as pltpu

_NEG = -1e30  # finite "minus infinity": post-ReLU activations are >= 0, so
              # this always loses the max-pool, and never creates NaN.


def _round_up(x, m):
    return (x + m - 1) // m * m


def _textcnn_kernel(tok_ref, table_hbm, w_ref, bias_ref, mask_ref,
                    fcw_ref, fcb_ref, out_ref, emb_ref, gather_sem,
                    *, compute_dtype):
    """Fused TextCNN forward for one batch tile.

    tok_ref    : (B*L,)          int32  token ids (SMEM, scalar-prefetched)
    table_hbm  : (V, E)          f32    embedding table (HBM, memory_space=ANY)
    w_ref      : (ks_max, E, NFp)       packed conv weights (tap-major, 0-pad)
    bias_ref   : (1, NFp)        f32    packed conv biases (lane padded)
    mask_ref   : (L, NFp)        f32    0 for valid conv rows, -1e30 otherwise
    fcw_ref    : (NFp, Cp)              fc weight (rows/cols zero padded)
    fcb_ref    : (1, Cp)         f32    fc bias (lane padded)
    out_ref    : (1, tb, Cp)     f32    logits for this batch tile
    emb_ref    : (tb*L, E)       f32    VMEM scratch for gathered rows
    gather_sem : (tb*L,)                one DMA semaphore per gathered row
    """
    L = mask_ref.shape[0]
    rows = emb_ref.shape[0]                       # tb * L
    tb = out_ref.shape[1]
    ks_max = w_ref.shape[0]
    NFp = w_ref.shape[2]
    base = pl.program_id(0) * rows

    # ---- Embedding lookup: per-row DMA gather from the HBM table. ----------
    # Start every row copy, then wait on all of them, keeping the gathers in
    # flight concurrently.  (Token ids are assumed in-range, like torch.)
    for r in range(rows):
        tid = tok_ref[base + r]
        pltpu.make_async_copy(table_hbm.at[tid], emb_ref.at[r],
                              gather_sem.at[r]).start()
    for r in range(rows):
        pltpu.make_async_copy(table_hbm.at[0], emb_ref.at[r],
                              gather_sem.at[r]).wait()

    emb_f32 = emb_ref[...]                                   # (rows, E) f32

    # ---- All conv branches, all taps: accumulate rotated MXU matmuls. ------
    # Tap j needs emb[t + j]; pltpu.roll by (rows - j) (== roll by -j) gives
    # it via the XLU with no concats or VMEM copies.  Rows that wrap past a
    # sequence end are exactly the rows the -1e30 mask removes before pooling.
    conv = jnp.dot(emb_f32.astype(compute_dtype), w_ref[0],
                   preferred_element_type=jnp.float32)       # (rows, NFp) f32
    for j in range(1, ks_max):
        shifted = pltpu.roll(emb_f32, shift=rows - j, axis=0)
        conv = conv + jnp.dot(shifted.astype(compute_dtype), w_ref[j],
                              preferred_element_type=jnp.float32)

    # ---- Bias + ReLU once, mask invalid rows AFTER ReLU, max-pool. ---------
    act = jnp.maximum(conv + bias_ref[...], 0.0)             # (rows, NFp)
    act = act.reshape(tb, L, NFp) + mask_ref[...][None]      # (tb, L, NFp)
    pooled = jnp.max(act, axis=1)                            # (tb, NFp)

    # ---- Final linear layer (C padded to 128 -> lane-dense store). ---------
    out_ref[0, :, :] = (jnp.dot(pooled.astype(compute_dtype), fcw_ref[...],
                                preferred_element_type=jnp.float32)
                        + fcb_ref[...])


def textcnn_forward(tokens, emb_table, conv_ws, conv_bs, fc_w, fc_b,
                    *, compute_dtype=jnp.bfloat16, batch_tile=None):
    """tokens: (B, L) int32 -> logits (B, num_class) float32.

    conv_ws: list of (ks, E, F) arrays (torch Conv2d weight (F,1,ks,E) moved);
    conv_bs: list of (1, F); fc_w: (n*F, C); fc_b: (1, C).
    """
    B, L = tokens.shape
    V, E = emb_table.shape
    kernel_sizes = tuple(int(w.shape[0]) for w in conv_ws)
    n = len(kernel_sizes)
    F = int(conv_ws[0].shape[-1])
    NF = n * F
    C = int(fc_w.shape[1])
    ks_max = max(kernel_sizes)
    assert ks_max <= L, "kernel_size must not exceed sequence length"
    # TODO(synk): for variable-length batches pad L up to a multiple of 8 in
    # this wrapper so the in-kernel (rows, NFp)->(tb, L, NFp) reshape stays
    # layout-free.

    # Lane padding: filter and class axes padded to full 128-lane width so the
    # VPU work and the output store run lane-dense.  Padded filter columns get
    # zero weights/bias and an all-zero mask, so they pool to 0 and multiply
    # zero rows of the padded fc weight -> logits are unchanged.
    NFp = _round_up(NF, 128)
    Cp = _round_up(C, 128)

    # Parameter packing (branch fusion): per-tap weights zero-padded to ks_max
    # taps, concatenated along the padded filter axis; matching bias and a
    # per-row validity mask (0 for t < L-ks+1, else -1e30) per branch.
    w_taps = jnp.zeros((ks_max, E, NFp), jnp.float32)
    bias = jnp.zeros((1, NFp), jnp.float32)
    mask = jnp.zeros((L, NFp), jnp.float32)
    for i, (w, b, ks) in enumerate(zip(conv_ws, conv_bs, kernel_sizes)):
        sl = slice(i * F, (i + 1) * F)
        w_taps = w_taps.at[:ks, :, sl].set(w.astype(jnp.float32))
        bias = bias.at[:, sl].set(b.reshape(1, F).astype(jnp.float32))
        lout = L - ks + 1
        col = jnp.where(jnp.arange(L)[:, None] < lout, 0.0, _NEG)
        mask = mask.at[:, sl].set(jnp.broadcast_to(col, (L, F)))

    fcw = jnp.zeros((NFp, Cp), jnp.float32).at[:NF, :C].set(
        fc_w.astype(jnp.float32))
    fcb = jnp.zeros((1, Cp), jnp.float32).at[:, :C].set(
        fc_b.reshape(1, C).astype(jnp.float32))

    tokens_flat = tokens.reshape(B * L).astype(jnp.int32)

    if batch_tile is None:
        # >= 2 grid steps so a v7x megacore shards the batch across both
        # TensorCores; for large B pick batch_tile so batch_tile*L >= 256.
        batch_tile = B // 2 if (B >= 2 and B % 2 == 0) else B
    tb = batch_tile
    assert B % tb == 0
    nb = B // tb

    kernel = functools.partial(_textcnn_kernel, compute_dtype=compute_dtype)

    grid_spec = pltpu.PrefetchScalarGridSpec(
        num_scalar_prefetch=1,                    # token ids -> SMEM
        grid=(nb,),
        in_specs=[
            # Embedding table stays in HBM; rows are DMA-gathered on demand,
            # so VMEM cost is independent of vocab size.
            pl.BlockSpec(memory_space=pl.ANY),
            # Constant-index parameter blocks (small).  On v7x / huge params,
            # single-buffer these with pipeline_mode=pl.Buffered(1).
            pl.BlockSpec((ks_max, E, NFp), lambda i, tok: (0, 0, 0)),
            pl.BlockSpec((1, NFp), lambda i, tok: (0, 0)),
            pl.BlockSpec((L, NFp), lambda i, tok: (0, 0)),
            pl.BlockSpec((NFp, Cp), lambda i, tok: (0, 0)),
            pl.BlockSpec((1, Cp), lambda i, tok: (0, 0)),
        ],
        out_specs=pl.BlockSpec((1, tb, Cp), lambda i, tok: (i, 0, 0)),
        scratch_shapes=[
            pltpu.VMEM((tb * L, E), jnp.float32),         # gathered embeddings
            pltpu.SemaphoreType.DMA((tb * L,)),           # one sem per row DMA
        ],
    )

    out_padded = pl.pallas_call(
        kernel,
        out_shape=jax.ShapeDtypeStruct((nb, tb, Cp), jnp.float32),
        grid_spec=grid_spec,
        compiler_params=pltpu.CompilerParams(
            dimension_semantics=("parallel",),
            # Tiny footprint here; explicit limit keeps batch-tile sizing
            # honest on v7x's smaller (64 MiB physical) VMEM as B/L grow.
            vmem_limit_bytes=32 * 1024 * 1024,
        ),
    )(tokens_flat, emb_table.astype(jnp.float32),
      w_taps.astype(compute_dtype), bias, mask,
      fcw.astype(compute_dtype), fcb)

    # Un-pad: (nb, tb, Cp) -> (B, C).
    return out_padded.reshape(B, Cp)[:, :C]


if __name__ == "__main__":
    key = jax.random.PRNGKey(0)

    vocab_size, embedding_dim = 50, 32
    kernel_sizes = (3, 4, 5)
    num_filters = 8
    num_class = 2
    B, L = 2, 16

    keys = jax.random.split(key, 4 + 2 * len(kernel_sizes))

    # "pretrained_embeddings" analogue — deterministic synthetic table.
    emb_table = 0.1 * jax.random.normal(keys[0], (vocab_size, embedding_dim),
                                        jnp.float32)
    tokens = jax.random.randint(keys[1], (B, L), 0, vocab_size, dtype=jnp.int32)

    conv_ws, conv_bs = [], []
    for i, ks in enumerate(kernel_sizes):
        # torch Conv2d weight shape: (num_filters, 1, ks, embedding_dim)
        w_t = 0.1 * jax.random.normal(keys[2 + 2 * i],
                                      (num_filters, 1, ks, embedding_dim),
                                      jnp.float32)
        b_t = 0.1 * jax.random.normal(keys[3 + 2 * i], (num_filters,),
                                      jnp.float32)
        conv_ws.append(jnp.transpose(w_t[:, 0], (1, 2, 0)))    # (ks, E, F)
        conv_bs.append(b_t.reshape(1, num_filters))            # (1, F)

    k_fc_w = keys[2 + 2 * len(kernel_sizes)]
    k_fc_b = keys[3 + 2 * len(kernel_sizes)]
    fc_w_t = 0.1 * jax.random.normal(
        k_fc_w, (num_class, len(kernel_sizes) * num_filters), jnp.float32)
    fc_b_t = 0.1 * jax.random.normal(k_fc_b, (num_class,), jnp.float32)
    fc_w = fc_w_t.T                          # (len(ks)*F, C)
    fc_b = fc_b_t.reshape(1, num_class)      # (1, C)

    out = textcnn_forward(tokens, emb_table, conv_ws, conv_bs, fc_w, fc_b)
    out = jax.block_until_ready(out)

    # Pure-JAX f32 reference for a correctness sanity check.
    emb = jnp.take(emb_table, tokens, axis=0)
    feats = []
    for w, b in zip(conv_ws, conv_bs):
        ks = w.shape[0]
        Lout = L - ks + 1
        conv = jnp.zeros((B, Lout, num_filters), jnp.float32)
        for j in range(ks):
            conv = conv + jnp.einsum('ble,ef->blf', emb[:, j:j + Lout, :], w[j])
        conv = jax.nn.relu(conv + b[None])
        feats.append(jnp.max(conv, axis=1))
    ref = jnp.concatenate(feats, axis=1) @ fc_w + fc_b

    assert out.shape == (B, num_class)
    # bf16 MXU compute (f32 accumulation) vs. f32 reference -> relaxed tol.
    assert jnp.allclose(out, ref, atol=2e-2, rtol=2e-2), (out, ref)
    print("KERNEL_OK")
</pallas_src>

<mosaic_0001>
module attributes {stable_mosaic.version = 11 : i64} {
  func.func @_textcnn_kernel(%arg0: i32, %arg1: memref<32xi32, #tpu.memory_space<smem>>, %arg2: memref<50x32xf32, #tpu.memory_space<any>>, %arg3: memref<5x32x128xbf16, #tpu.memory_space<vmem>>, %arg4: memref<1x128xf32, #tpu.memory_space<vmem>>, %arg5: memref<16x128xf32, #tpu.memory_space<vmem>>, %arg6: memref<128x128xbf16, #tpu.memory_space<vmem>>, %arg7: memref<1x128xf32, #tpu.memory_space<vmem>>, %arg8: memref<1x1x128xf32, #tpu.memory_space<vmem>>, %arg9: memref<16x32xf32, #tpu.memory_space<vmem>>, %arg10: memref<16x!tpu.dma_semaphore, #tpu.memory_space<semaphore_mem>>) attributes {dimension_semantics = [#tpu.dimension_semantics<parallel>], iteration_bounds = array<i64: 2>, scalar_prefetch = 1 : i64, scratch_operands = 2 : i64, tpu.core_type = #tpu.core_type<tc>, window_params = [{}, {pipeline_mode = #tpu.pipeline_mode<synchronous>, transform_indices = @transform_1, window_bounds = array<i64: 5, 32, 128>}, {pipeline_mode = #tpu.pipeline_mode<synchronous>, transform_indices = @transform_2, window_bounds = array<i64: 1, 128>}, {pipeline_mode = #tpu.pipeline_mode<synchronous>, transform_indices = @transform_3, window_bounds = array<i64: 16, 128>}, {pipeline_mode = #tpu.pipeline_mode<synchronous>, transform_indices = @transform_4, window_bounds = array<i64: 128, 128>}, {pipeline_mode = #tpu.pipeline_mode<synchronous>, transform_indices = @transform_5, window_bounds = array<i64: 1, 128>}, {transform_indices = @transform_6, window_bounds = array<i64: 1, 1, 128>}]} {
    %c16_i32 = arith.constant 16 : i32
    %0 = arith.muli %arg0, %c16_i32 : i32
    %c0_i32 = arith.constant 0 : i32
    %1 = arith.addi %0, %c0_i32 : i32
    %2 = arith.index_cast %1 : i32 to index
    %3 = memref.load %arg1[%2] : memref<32xi32, #tpu.memory_space<smem>>
    %c0_i32_0 = arith.constant 0 : i32
    %c0_i32_1 = arith.constant 0 : i32
    %c0_i32_2 = arith.constant 0 : i32
    %4 = tpu.memref_slice %arg2[%3, %c0_i32_2] : memref<50x32xf32, #tpu.memory_space<any>> -> memref<1x32xf32, #tpu.memory_space<any>>
    %5 = tpu.memref_squeeze %4 : memref<1x32xf32, #tpu.memory_space<any>> -> memref<32xf32, #tpu.memory_space<any>>
    %c0_i32_3 = arith.constant 0 : i32
    %6 = tpu.memref_slice %arg9[%c0_i32_0, %c0_i32_3] : memref<16x32xf32, #tpu.memory_space<vmem>> -> memref<1x32xf32, #tpu.memory_space<vmem>>
    %7 = tpu.memref_squeeze %6 : memref<1x32xf32, #tpu.memory_space<vmem>> -> memref<32xf32, #tpu.memory_space<vmem>>
    %8 = tpu.memref_slice %arg10[%c0_i32_1] : memref<16x!tpu.dma_semaphore, #tpu.memory_space<semaphore_mem>> -> memref<1x!tpu.dma_semaphore, #tpu.memory_space<semaphore_mem>>
    %9 = tpu.memref_squeeze %8 : memref<1x!tpu.dma_semaphore, #tpu.memory_space<semaphore_mem>> -> memref<!tpu.dma_semaphore, #tpu.memory_space<semaphore_mem>>
    tpu.enqueue_dma source(%5 : memref<32xf32, #tpu.memory_space<any>>) target(%7 : memref<32xf32, #tpu.memory_space<vmem>>) target_semaphore(%9 : memref<!tpu.dma_semaphore, #tpu.memory_space<semaphore_mem>>)
    %c1_i32 = arith.constant 1 : i32
    %10 = arith.addi %0, %c1_i32 : i32
    %11 = arith.index_cast %10 : i32 to index
    %12 = memref.load %arg1[%11] : memref<32xi32, #tpu.memory_space<smem>>
    %c1_i32_4 = arith.constant 1 : i32
    %c1_i32_5 = arith.constant 1 : i32
    %c0_i32_6 = arith.constant 0 : i32
    %13 = tpu.memref_slice %arg2[%12, %c0_i32_6] : memref<50x32xf32, #tpu.memory_space<any>> -> memref<1x32xf32, #tpu.memory_space<any>>
    %14 = tpu.memref_squeeze %13 : memref<1x32xf32, #tpu.memory_space<any>> -> memref<32xf32, #tpu.memory_space<any>>
    %c0_i32_7 = arith.constant 0 : i32
    %15 = tpu.memref_slice %arg9[%c1_i32_4, %c0_i32_7] : memref<16x32xf32, #tpu.memory_space<vmem>> -> memref<1x32xf32, #tpu.memory_space<vmem>>
    %16 = tpu.memref_squeeze %15 : memref<1x32xf32, #tpu.memory_space<vmem>> -> memref<32xf32, #tpu.memory_space<vmem>>
    %17 = tpu.memref_slice %arg10[%c1_i32_5] : memref<16x!tpu.dma_semaphore, #tpu.memory_space<semaphore_mem>> -> memref<1x!tpu.dma_semaphore, #tpu.memory_space<semaphore_mem>>
    %18 = tpu.memref_squeeze %17 : memref<1x!tpu.dma_semaphore, #tpu.memory_space<semaphore_mem>> -> memref<!tpu.dma_semaphore, #tpu.memory_space<semaphore_mem>>
    tpu.enqueue_dma source(%14 : memref<32xf32, #tpu.memory_space<any>>) target(%16 : memref<32xf32, #tpu.memory_space<vmem>>) target_semaphore(%18 : memref<!tpu.dma_semaphore, #tpu.memory_space<semaphore_mem>>)
    %c2_i32 = arith.constant 2 : i32
    %19 = arith.addi %0, %c2_i32 : i32
    %20 = arith.index_cast %19 : i32 to index
    %21 = memref.load %arg1[%20] : memref<32xi32, #tpu.memory_space<smem>>
    %c2_i32_8 = arith.constant 2 : i32
    %c2_i32_9 = arith.constant 2 : i32
    %c0_i32_10 = arith.constant 0 : i32
    %22 = tpu.memref_slice %arg2[%21, %c0_i32_10] : memref<50x32xf32, #tpu.memory_space<any>> -> memref<1x32xf32, #tpu.memory_space<any>>
    %23 = tpu.memref_squeeze %22 : memref<1x32xf32, #tpu.memory_space<any>> -> memref<32xf32, #tpu.memory_space<any>>
    %c0_i32_11 = arith.constant 0 : i32
    %24 = tpu.memref_slice %arg9[%c2_i32_8, %c0_i32_11] : memref<16x32xf32, #tpu.memory_space<vmem>> -> memref<1x32xf32, #tpu.memory_space<vmem>>
    %25 = tpu.memref_squeeze %24 : memref<1x32xf32, #tpu.memory_space<vmem>> -> memref<32xf32, #tpu.memory_space<vmem>>
    %26 = tpu.memref_slice %arg10[%c2_i32_9] : memref<16x!tpu.dma_semaphore, #tpu.memory_space<semaphore_mem>> -> memref<1x!tpu.dma_semaphore, #tpu.memory_space<semaphore_mem>>
    %27 = tpu.memref_squeeze %26 : memref<1x!tpu.dma_semaphore, #tpu.memory_space<semaphore_mem>> -> memref<!tpu.dma_semaphore, #tpu.memory_space<semaphore_mem>>
    tpu.enqueue_dma source(%23 : memref<32xf32, #tpu.memory_space<any>>) target(%25 : memref<32xf32, #tpu.memory_space<vmem>>) target_semaphore(%27 : memref<!tpu.dma_semaphore, #tpu.memory_space<semaphore_mem>>)
    %c3_i32 = arith.constant 3 : i32
    %28 = arith.addi %0, %c3_i32 : i32
    %29 = arith.index_cast %28 : i32 to index
    %30 = memref.load %arg1[%29] : memref<32xi32, #tpu.memory_space<smem>>
    %c3_i32_12 = arith.constant 3 : i32
    %c3_i32_13 = arith.constant 3 : i32
    %c0_i32_14 = arith.constant 0 : i32
    %31 = tpu.memref_slice %arg2[%30, %c0_i32_14] : memref<50x32xf32, #tpu.memory_space<any>> -> memref<1x32xf32, #tpu.memory_space<any>>
    %32 = tpu.memref_squeeze %31 : memref<1x32xf32, #tpu.memory_space<any>> -> memref<32xf32, #tpu.memory_space<any>>
    %c0_i32_15 = arith.constant 0 : i32
    %33 = tpu.memref_slice %arg9[%c3_i32_12, %c0_i32_15] : memref<16x32xf32, #tpu.memory_space<vmem>> -> memref<1x32xf32, #tpu.memory_space<vmem>>
    %34 = tpu.memref_squeeze %33 : memref<1x32xf32, #tpu.memory_space<vmem>> -> memref<32xf32, #tpu.memory_space<vmem>>
    %35 = tpu.memref_slice %arg10[%c3_i32_13] : memref<16x!tpu.dma_semaphore, #tpu.memory_space<semaphore_mem>> -> memref<1x!tpu.dma_semaphore, #tpu.memory_space<semaphore_mem>>
    %36 = tpu.memref_squeeze %35 : memref<1x!tpu.dma_semaphore, #tpu.memory_space<semaphore_mem>> -> memref<!tpu.dma_semaphore, #tpu.memory_space<semaphore_mem>>
    tpu.enqueue_dma source(%32 : memref<32xf32, #tpu.memory_space<any>>) target(%34 : memref<32xf32, #tpu.memory_space<vmem>>) target_semaphore(%36 : memref<!tpu.dma_semaphore, #tpu.memory_space<semaphore_mem>>)
    %c4_i32 = arith.constant 4 : i32
    %37 = arith.addi %0, %c4_i32 : i32
    %38 = arith.index_cast %37 : i32 to index
    %39 = memref.load %arg1[%38] : memref<32xi32, #tpu.memory_space<smem>>
    %c4_i32_16 = arith.constant 4 : i32
    %c4_i32_17 = arith.constant 4 : i32
    %c0_i32_18 = arith.constant 0 : i32
    %40 = tpu.memref_slice %arg2[%39, %c0_i32_18] : memref<50x32xf32, #tpu.memory_space<any>> -> memref<1x32xf32, #tpu.memory_space<any>>
    %41 = tpu.memref_squeeze %40 : memref<1x32xf32, #tpu.memory_space<any>> -> memref<32xf32, #tpu.memory_space<any>>
    %c0_i32_19 = arith.constant 0 : i32
    %42 = tpu.memref_slice %arg9[%c4_i32_16, %c0_i32_19] : memref<16x32xf32, #tpu.memory_space<vmem>> -> memref<1x32xf32, #tpu.memory_space<vmem>>
    %43 = tpu.memref_squeeze %42 : memref<1x32xf32, #tpu.memory_space<vmem>> -> memref<32xf32, #tpu.memory_space<vmem>>
    %44 = tpu.memref_slice %arg10[%c4_i32_17] : memref<16x!tpu.dma_semaphore, #tpu.memory_space<semaphore_mem>> -> memref<1x!tpu.dma_semaphore, #tpu.memory_space<semaphore_mem>>
    %45 = tpu.memref_squeeze %44 : memref<1x!tpu.dma_semaphore, #tpu.memory_space<semaphore_mem>> -> memref<!tpu.dma_semaphore, #tpu.memory_space<semaphore_mem>>
    tpu.enqueue_dma source(%41 : memref<32xf32, #tpu.memory_space<any>>) target(%43 : memref<32xf32, #tpu.memory_space<vmem>>) target_semaphore(%45 : memref<!tpu.dma_semaphore, #tpu.memory_space<semaphore_mem>>)
    %c5_i32 = arith.constant 5 : i32
    %46 = arith.addi %0, %c5_i32 : i32
    %47 = arith.index_cast %46 : i32 to index
    %48 = memref.load %arg1[%47] : memref<32xi32, #tpu.memory_space<smem>>
    %c5_i32_20 = arith.constant 5 : i32
    %c5_i32_21 = arith.constant 5 : i32
    %c0_i32_22 = arith.constant 0 : i32
    %49 = tpu.memref_slice %arg2[%48, %c0_i32_22] : memref<50x32xf32, #tpu.memory_space<any>> -> memref<1x32xf32, #tpu.memory_space<any>>
    %50 = tpu.memref_squeeze %49 : memref<1x32xf32, #tpu.memory_space<any>> -> memref<32xf32, #tpu.memory_space<any>>
    %c0_i32_23 = arith.constant 0 : i32
    %51 = tpu.memref_slice %arg9[%c5_i32_20, %c0_i32_23] : memref<16x32xf32, #tpu.memory_space<vmem>> -> memref<1x32xf32, #tpu.memory_space<vmem>>
    %52 = tpu.memref_squeeze %51 : memref<1x32xf32, #tpu.memory_space<vmem>> -> memref<32xf32, #tpu.memory_space<vmem>>
    %53 = tpu.memref_slice %arg10[%c5_i32_21] : memref<16x!tpu.dma_semaphore, #tpu.memory_space<semaphore_mem>> -> memref<1x!tpu.dma_semaphore, #tpu.memory_space<semaphore_mem>>
    %54 = tpu.memref_squeeze %53 : memref<1x!tpu.dma_semaphore, #tpu.memory_space<semaphore_mem>> -> memref<!tpu.dma_semaphore, #tpu.memory_space<semaphore_mem>>
    tpu.enqueue_dma source(%50 : memref<32xf32, #tpu.memory_space<any>>) target(%52 : memref<32xf32, #tpu.memory_space<vmem>>) target_semaphore(%54 : memref<!tpu.dma_semaphore, #tpu.memory_space<semaphore_mem>>)
    %c6_i32 = arith.constant 6 : i32
    %55 = arith.addi %0, %c6_i32 : i32
    %56 = arith.index_cast %55 : i32 to index
    %57 = memref.load %arg1[%56] : memref<32xi32, #tpu.memory_space<smem>>
    %c6_i32_24 = arith.constant 6 : i32
    %c6_i32_25 = arith.constant 6 : i32
    %c0_i32_26 = arith.constant 0 : i32
    %58 = tpu.memref_slice %arg2[%57, %c0_i32_26] : memref<50x32xf32, #tpu.memory_space<any>> -> memref<1x32xf32, #tpu.memory_space<any>>
    %59 = tpu.memref_squeeze %58 : memref<1x32xf32, #tpu.memory_space<any>> -> memref<32xf32, #tpu.memory_space<any>>
    %c0_i32_27 = arith.constant 0 : i32
    %60 = tpu.memref_slice %arg9[%c6_i32_24, %c0_i32_27] : memref<16x32xf32, #tpu.memory_space<vmem>> -> memref<1x32xf32, #tpu.memory_space<vmem>>
    %61 = tpu.memref_squeeze %60 : memref<1x32xf32, #tpu.memory_space<vmem>> -> memref<32xf32, #tpu.memory_space<vmem>>
    %62 = tpu.memref_slice %arg10[%c6_i32_25] : memref<16x!tpu.dma_semaphore, #tpu.memory_space<semaphore_mem>> -> memref<1x!tpu.dma_semaphore, #tpu.memory_space<semaphore_mem>>
    %63 = tpu.memref_squeeze %62 : memref<1x!tpu.dma_semaphore, #tpu.memory_space<semaphore_mem>> -> memref<!tpu.dma_semaphore, #tpu.memory_space<semaphore_mem>>
    tpu.enqueue_dma source(%59 : memref<32xf32, #tpu.memory_space<any>>) target(%61 : memref<32xf32, #tpu.memory_space<vmem>>) target_semaphore(%63 : memref<!tpu.dma_semaphore, #tpu.memory_space<semaphore_mem>>)
    %c7_i32 = arith.constant 7 : i32
    %64 = arith.addi %0, %c7_i32 : i32
    %65 = arith.index_cast %64 : i32 to index
    %66 = memref.load %arg1[%65] : memref<32xi32, #tpu.memory_space<smem>>
    %c7_i32_28 = arith.constant 7 : i32
    %c7_i32_29 = arith.constant 7 : i32
    %c0_i32_30 = arith.constant 0 : i32
    %67 = tpu.memref_slice %arg2[%66, %c0_i32_30] : memref<50x32xf32, #tpu.memory_space<any>> -> memref<1x32xf32, #tpu.memory_space<any>>
    %68 = tpu.memref_squeeze %67 : memref<1x32xf32, #tpu.memory_space<any>> -> memref<32xf32, #tpu.memory_space<any>>
    %c0_i32_31 = arith.constant 0 : i32
    %69 = tpu.memref_slice %arg9[%c7_i32_28, %c0_i32_31] : memref<16x32xf32, #tpu.memory_space<vmem>> -> memref<1x32xf32, #tpu.memory_space<vmem>>
    %70 = tpu.memref_squeeze %69 : memref<1x32xf32, #tpu.memory_space<vmem>> -> memref<32xf32, #tpu.memory_space<vmem>>
    %71 = tpu.memref_slice %arg10[%c7_i32_29] : memref<16x!tpu.dma_semaphore, #tpu.memory_space<semaphore_mem>> -> memref<1x!tpu.dma_semaphore, #tpu.memory_space<semaphore_mem>>
    %72 = tpu.memref_squeeze %71 : memref<1x!tpu.dma_semaphore, #tpu.memory_space<semaphore_mem>> -> memref<!tpu.dma_semaphore, #tpu.memory_space<semaphore_mem>>
    tpu.enqueue_dma source(%68 : memref<32xf32, #tpu.memory_space<any>>) target(%70 : memref<32xf32, #tpu.memory_space<vmem>>) target_semaphore(%72 : memref<!tpu.dma_semaphore, #tpu.memory_space<semaphore_mem>>)
    %c8_i32 = arith.constant 8 : i32
    %73 = arith.addi %0, %c8_i32 : i32
    %74 = arith.index_cast %73 : i32 to index
    %75 = memref.load %arg1[%74] : memref<32xi32, #tpu.memory_space<smem>>
    %c8_i32_32 = arith.constant 8 : i32
    %c8_i32_33 = arith.constant 8 : i32
    %c0_i32_34 = arith.constant 0 : i32
    %76 = tpu.memref_slice %arg2[%75, %c0_i32_34] : memref<50x32xf32, #tpu.memory_space<any>> -> memref<1x32xf32, #tpu.memory_space<any>>
    %77 = tpu.memref_squeeze %76 : memref<1x32xf32, #tpu.memory_space<any>> -> memref<32xf32, #tpu.memory_space<any>>
    %c0_i32_35 = arith.constant 0 : i32
    %78 = tpu.memref_slice %arg9[%c8_i32_32, %c0_i32_35] : memref<16x32xf32, #tpu.memory_space<vmem>> -> memref<1x32xf32, #tpu.memory_space<vmem>>
    %79 = tpu.memref_squeeze %78 : memref<1x32xf32, #tpu.memory_space<vmem>> -> memref<32xf32, #tpu.memory_space<vmem>>
    %80 = tpu.memref_slice %arg10[%c8_i32_33] : memref<16x!tpu.dma_semaphore, #tpu.memory_space<semaphore_mem>> -> memref<1x!tpu.dma_semaphore, #tpu.memory_space<semaphore_mem>>
    %81 = tpu.memref_squeeze %80 : memref<1x!tpu.dma_semaphore, #tpu.memory_space<semaphore_mem>> -> memref<!tpu.dma_semaphore, #tpu.memory_space<semaphore_mem>>
    tpu.enqueue_dma source(%77 : memref<32xf32, #tpu.memory_space<any>>) target(%79 : memref<32xf32, #tpu.memory_space<vmem>>) target_semaphore(%81 : memref<!tpu.dma_semaphore, #tpu.memory_space<semaphore_mem>>)
    %c9_i32 = arith.constant 9 : i32
    %82 = arith.addi %0, %c9_i32 : i32
    %83 = arith.index_cast %82 : i32 to index
    %84 = memref.load %arg1[%83] : memref<32xi32, #tpu.memory_space<smem>>
    %c9_i32_36 = arith.constant 9 : i32
    %c9_i32_37 = arith.constant 9 : i32
    %c0_i32_38 = arith.constant 0 : i32
    %85 = tpu.memref_slice %arg2[%84, %c0_i32_38] : memref<50x32xf32, #tpu.memory_space<any>> -> memref<1x32xf32, #tpu.memory_space<any>>
    %86 = tpu.memref_squeeze %85 : memref<1x32xf32, #tpu.memory_space<any>> -> memref<32xf32, #tpu.memory_space<any>>
    %c0_i32_39 = arith.constant 0 : i32
    %87 = tpu.memref_slice %arg9[%c9_i32_36, %c0_i32_39] : memref<16x32xf32, #tpu.memory_space<vmem>> -> memref<1x32xf32, #tpu.memory_space<vmem>>
    %88 = tpu.memref_squeeze %87 : memref<1x32xf32, #tpu.memory_space<vmem>> -> memref<32xf32, #tpu.memory_space<vmem>>
    %89 = tpu.memref_slice %arg10[%c9_i32_37] : memref<16x!tpu.dma_semaphore, #tpu.memory_space<semaphore_mem>> -> memref<1x!tpu.dma_semaphore, #tpu.memory_space<semaphore_mem>>
    %90 = tpu.memref_squeeze %89 : memref<1x!tpu.dma_semaphore, #tpu.memory_space<semaphore_mem>> -> memref<!tpu.dma_semaphore, #tpu.memory_space<semaphore_mem>>
    tpu.enqueue_dma source(%86 : memref<32xf32, #tpu.memory_space<any>>) target(%88 : memref<32xf32, #tpu.memory_space<vmem>>) target_semaphore(%90 : memref<!tpu.dma_semaphore, #tpu.memory_space<semaphore_mem>>)
    %c10_i32 = arith.constant 10 : i32
    %91 = arith.addi %0, %c10_i32 : i32
    %92 = arith.index_cast %91 : i32 to index
    %93 = memref.load %arg1[%92] : memref<32xi32, #tpu.memory_space<smem>>
    %c10_i32_40 = arith.constant 10 : i32
    %c10_i32_41 = arith.constant 10 : i32
    %c0_i32_42 = arith.constant 0 : i32
    %94 = tpu.memref_slice %arg2[%93, %c0_i32_42] : memref<50x32xf32, #tpu.memory_space<any>> -> memref<1x32xf32, #tpu.memory_space<any>>
    %95 = tpu.memref_squeeze %94 : memref<1x32xf32, #tpu.memory_space<any>> -> memref<32xf32, #tpu.memory_space<any>>
    %c0_i32_43 = arith.constant 0 : i32
    %96 = tpu.memref_slice %arg9[%c10_i32_40, %c0_i32_43] : memref<16x32xf32, #tpu.memory_space<vmem>> -> memref<1x32xf32, #tpu.memory_space<vmem>>
    %97 = tpu.memref_squeeze %96 : memref<1x32xf32, #tpu.memory_space<vmem>> -> memref<32xf32, #tpu.memory_space<vmem>>
    %98 = tpu.memref_slice %arg10[%c10_i32_41] : memref<16x!tpu.dma_semaphore, #tpu.memory_space<semaphore_mem>> -> memref<1x!tpu.dma_semaphore, #tpu.memory_space<semaphore_mem>>
    %99 = tpu.memref_squeeze %98 : memref<1x!tpu.dma_semaphore, #tpu.memory_space<semaphore_mem>> -> memref<!tpu.dma_semaphore, #tpu.memory_space<semaphore_mem>>
    tpu.enqueue_dma source(%95 : memref<32xf32, #tpu.memory_space<any>>) target(%97 : memref<32xf32, #tpu.memory_space<vmem>>) target_semaphore(%99 : memref<!tpu.dma_semaphore, #tpu.memory_space<semaphore_mem>>)
    %c11_i32 = arith.constant 11 : i32
    %100 = arith.addi %0, %c11_i32 : i32
    %101 = arith.index_cast %100 : i32 to index
    %102 = memref.load %arg1[%101] : memref<32xi32, #tpu.memory_space<smem>>
    %c11_i32_44 = arith.constant 11 : i32
    %c11_i32_45 = arith.constant 11 : i32
    %c0_i32_46 = arith.constant 0 : i32
    %103 = tpu.memref_slice %arg2[%102, %c0_i32_46] : memref<50x32xf32, #tpu.memory_space<any>> -> memref<1x32xf32, #tpu.memory_space<any>>
    %104 = tpu.memref_squeeze %103 : memref<1x32xf32, #tpu.memory_space<any>> -> memref<32xf32, #tpu.memory_space<any>>
    %c0_i32_47 = arith.constant 0 : i32
    %105 = tpu.memref_slice %arg9[%c11_i32_44, %c0_i32_47] : memref<16x32xf32, #tpu.memory_space<vmem>> -> memref<1x32xf32, #tpu.memory_space<vmem>>
    %106 = tpu.memref_squeeze %105 : memref<1x32xf32, #tpu.memory_space<vmem>> -> memref<32xf32, #tpu.memory_space<vmem>>
    %107 = tpu.memref_slice %arg10[%c11_i32_45] : memref<16x!tpu.dma_semaphore, #tpu.memory_space<semaphore_mem>> -> memref<1x!tpu.dma_semaphore, #tpu.memory_space<semaphore_mem>>
    %108 = tpu.memref_squeeze %107 : memref<1x!tpu.dma_semaphore, #tpu.memory_space<semaphore_mem>> -> memref<!tpu.dma_semaphore, #tpu.memory_space<semaphore_mem>>
    tpu.enqueue_dma source(%104 : memref<32xf32, #tpu.memory_space<any>>) target(%106 : memref<32xf32, #tpu.memory_space<vmem>>) target_semaphore(%108 : memref<!tpu.dma_semaphore, #tpu.memory_space<semaphore_mem>>)
    %c12_i32 = arith.constant 12 : i32
    %109 = arith.addi %0, %c12_i32 : i32
    %110 = arith.index_cast %109 : i32 to index
    %111 = memref.load %arg1[%110] : memref<32xi32, #tpu.memory_space<smem>>
    %c12_i32_48 = arith.constant 12 : i32
    %c12_i32_49 = arith.constant 12 : i32
    %c0_i32_50 = arith.constant 0 : i32
    %112 = tpu.memref_slice %arg2[%111, %c0_i32_50] : memref<50x32xf32, #tpu.memory_space<any>> -> memref<1x32xf32, #tpu.memory_space<any>>
    %113 = tpu.memref_squeeze %112 : memref<1x32xf32, #tpu.memory_space<any>> -> memref<32xf32, #tpu.memory_space<any>>
    %c0_i32_51 = arith.constant 0 : i32
    %114 = tpu.memref_slice %arg9[%c12_i32_48, %c0_i32_51] : memref<16x32xf32, #tpu.memory_space<vmem>> -> memref<1x32xf32, #tpu.memory_space<vmem>>
    %115 = tpu.memref_squeeze %114 : memref<1x32xf32, #tpu.memory_space<vmem>> -> memref<32xf32, #tpu.memory_space<vmem>>
    %116 = tpu.memref_slice %arg10[%c12_i32_49] : memref<16x!tpu.dma_semaphore, #tpu.memory_space<semaphore_mem>> -> memref<1x!tpu.dma_semaphore, #tpu.memory_space<semaphore_mem>>
    %117 = tpu.memref_squeeze %116 : memref<1x!tpu.dma_semaphore, #tpu.memory_space<semaphore_mem>> -> memref<!tpu.dma_semaphore, #tpu.memory_space<semaphore_mem>>
    tpu.enqueue_dma source(%113 : memref<32xf32, #tpu.memory_space<any>>) target(%115 : memref<32xf32, #tpu.memory_space<vmem>>) target_semaphore(%117 : memref<!tpu.dma_semaphore, #tpu.memory_space<semaphore_mem>>)
    %c13_i32 = arith.constant 13 : i32
    %118 = arith.addi %0, %c13_i32 : i32
    %119 = arith.index_cast %118 : i32 to index
    %120 = memref.load %arg1[%119] : memref<32xi32, #tpu.memory_space<smem>>
    %c13_i32_52 = arith.constant 13 : i32
    %c13_i32_53 = arith.constant 13 : i32
    %c0_i32_54 = arith.constant 0 : i32
    %121 = tpu.memref_slice %arg2[%120, %c0_i32_54] : memref<50x32xf32, #tpu.memory_space<any>> -> memref<1x32xf32, #tpu.memory_space<any>>
    %122 = tpu.memref_squeeze %121 : memref<1x32xf32, #tpu.memory_space<any>> -> memref<32xf32, #tpu.memory_space<any>>
    %c0_i32_55 = arith.constant 0 : i32
    %123 = tpu.memref_slice %arg9[%c13_i32_52, %c0_i32_55] : memref<16x32xf32, #tpu.memory_space<vmem>> -> memref<1x32xf32, #tpu.memory_space<vmem>>
    %124 = tpu.memref_squeeze %123 : memref<1x32xf32, #tpu.memory_space<vmem>> -> memref<32xf32, #tpu.memory_space<vmem>>
    %125 = tpu.memref_slice %arg10[%c13_i32_53] : memref<16x!tpu.dma_semaphore, #tpu.memory_space<semaphore_mem>> -> memref<1x!tpu.dma_semaphore, #tpu.memory_space<semaphore_mem>>
    %126 = tpu.memref_squeeze %125 : memref<1x!tpu.dma_semaphore, #tpu.memory_space<semaphore_mem>> -> memref<!tpu.dma_semaphore, #tpu.memory_space<semaphore_mem>>
    tpu.enqueue_dma source(%122 : memref<32xf32, #tpu.memory_space<any>>) target(%124 : memref<32xf32, #tpu.memory_space<vmem>>) target_semaphore(%126 : memref<!tpu.dma_semaphore, #tpu.memory_space<semaphore_mem>>)
    %c14_i32 = arith.constant 14 : i32
    %127 = arith.addi %0, %c14_i32 : i32
    %128 = arith.index_cast %127 : i32 to index
    %129 = memref.load %arg1[%128] : memref<32xi32, #tpu.memory_space<smem>>
    %c14_i32_56 = arith.constant 14 : i32
    %c14_i32_57 = arith.constant 14 : i32
    %c0_i32_58 = arith.constant 0 : i32
    %130 = tpu.memref_slice %arg2[%129, %c0_i32_58] : memref<50x32xf32, #tpu.memory_space<any>> -> memref<1x32xf32, #tpu.memory_space<any>>
    %131 = tpu.memref_squeeze %130 : memref<1x32xf32, #tpu.memory_space<any>> -> memref<32xf32, #tpu.memory_space<any>>
    %c0_i32_59 = arith.constant 0 : i32
    %132 = tpu.memref_slice %arg9[%c14_i32_56, %c0_i32_59] : memref<16x32xf32, #tpu.memory_space<vmem>> -> memref<1x32xf32, #tpu.memory_space<vmem>>
    %133 = tpu.memref_squeeze %132 : memref<1x32xf32, #tpu.memory_space<vmem>> -> memref<32xf32, #tpu.memory_space<vmem>>
    %134 = tpu.memref_slice %arg10[%c14_i32_57] : memref<16x!tpu.dma_semaphore, #tpu.memory_space<semaphore_mem>> -> memref<1x!tpu.dma_semaphore, #tpu.memory_space<semaphore_mem>>
    %135 = tpu.memref_squeeze %134 : memref<1x!tpu.dma_semaphore, #tpu.memory_space<semaphore_mem>> -> memref<!tpu.dma_semaphore, #tpu.memory_space<semaphore_mem>>
    tpu.enqueue_dma source(%131 : memref<32xf32, #tpu.memory_space<any>>) target(%133 : memref<32xf32, #tpu.memory_space<vmem>>) target_semaphore(%135 : memref<!tpu.dma_semaphore, #tpu.memory_space<semaphore_mem>>)
    %c15_i32 = arith.constant 15 : i32
    %136 = arith.addi %0, %c15_i32 : i32
    %137 = arith.index_cast %136 : i32 to index
    %138 = memref.load %arg1[%137] : memref<32xi32, #tpu.memory_space<smem>>
    %c15_i32_60 = arith.constant 15 : i32
    %c15_i32_61 = arith.constant 15 : i32
    %c0_i32_62 = arith.constant 0 : i32
    %139 = tpu.memref_slice %arg2[%138, %c0_i32_62] : memref<50x32xf32, #tpu.memory_space<any>> -> memref<1x32xf32, #tpu.memory_space<any>>
    %140 = tpu.memref_squeeze %139 : memref<1x32xf32, #tpu.memory_space<any>> -> memref<32xf32, #tpu.memory_space<any>>
    %c0_i32_63 = arith.constant 0 : i32
    %141 = tpu.memref_slice %arg9[%c15_i32_60, %c0_i32_63] : memref<16x32xf32, #tpu.memory_space<vmem>> -> memref<1x32xf32, #tpu.memory_space<vmem>>
    %142 = tpu.memref_squeeze %141 : memref<1x32xf32, #tpu.memory_space<vmem>> -> memref<32xf32, #tpu.memory_space<vmem>>
    %143 = tpu.memref_slice %arg10[%c15_i32_61] : memref<16x!tpu.dma_semaphore, #tpu.memory_space<semaphore_mem>> -> memref<1x!tpu.dma_semaphore, #tpu.memory_space<semaphore_mem>>
    %144 = tpu.memref_squeeze %143 : memref<1x!tpu.dma_semaphore, #tpu.memory_space<semaphore_mem>> -> memref<!tpu.dma_semaphore, #tpu.memory_space<semaphore_mem>>
    tpu.enqueue_dma source(%140 : memref<32xf32, #tpu.memory_space<any>>) target(%142 : memref<32xf32, #tpu.memory_space<vmem>>) target_semaphore(%144 : memref<!tpu.dma_semaphore, #tpu.memory_space<semaphore_mem>>)
    %c0_i32_64 = arith.constant 0 : i32
    %c0_i32_65 = arith.constant 0 : i32
    %c0_i32_66 = arith.constant 0 : i32
    %c0_i32_67 = arith.constant 0 : i32
    %145 = tpu.memref_slice %arg2[%c0_i32_64, %c0_i32_67] : memref<50x32xf32, #tpu.memory_space<any>> -> memref<1x32xf32, #tpu.memory_space<any>>
    %146 = tpu.memref_squeeze %145 : memref<1x32xf32, #tpu.memory_space<any>> -> memref<32xf32, #tpu.memory_space<any>>
    %c0_i32_68 = arith.constant 0 : i32
    %147 = tpu.memref_slice %arg9[%c0_i32_65, %c0_i32_68] : memref<16x32xf32, #tpu.memory_space<vmem>> -> memref<1x32xf32, #tpu.memory_space<vmem>>
    %148 = tpu.memref_squeeze %147 : memref<1x32xf32, #tpu.memory_space<vmem>> -> memref<32xf32, #tpu.memory_space<vmem>>
    %149 = tpu.memref_slice %arg10[%c0_i32_66] : memref<16x!tpu.dma_semaphore, #tpu.memory_space<semaphore_mem>> -> memref<1x!tpu.dma_semaphore, #tpu.memory_space<semaphore_mem>>
    %150 = tpu.memref_squeeze %149 : memref<1x!tpu.dma_semaphore, #tpu.memory_space<semaphore_mem>> -> memref<!tpu.dma_semaphore, #tpu.memory_space<semaphore_mem>>
    tpu.wait_dma2 semaphore(%150 : memref<!tpu.dma_semaphore, #tpu.memory_space<semaphore_mem>>) src(%146 : memref<32xf32, #tpu.memory_space<any>>) dst(%148 : memref<32xf32, #tpu.memory_space<vmem>>)
    %c0_i32_69 = arith.constant 0 : i32
    %c1_i32_70 = arith.constant 1 : i32
    %c1_i32_71 = arith.constant 1 : i32
    %c0_i32_72 = arith.constant 0 : i32
    %151 = tpu.memref_slice %arg2[%c0_i32_69, %c0_i32_72] : memref<50x32xf32, #tpu.memory_space<any>> -> memref<1x32xf32, #tpu.memory_space<any>>
    %152 = tpu.memref_squeeze %151 : memref<1x32xf32, #tpu.memory_space<any>> -> memref<32xf32, #tpu.memory_space<any>>
    %c0_i32_73 = arith.constant 0 : i32
    %153 = tpu.memref_slice %arg9[%c1_i32_70, %c0_i32_73] : memref<16x32xf32, #tpu.memory_space<vmem>> -> memref<1x32xf32, #tpu.memory_space<vmem>>
    %154 = tpu.memref_squeeze %153 : memref<1x32xf32, #tpu.memory_space<vmem>> -> memref<32xf32, #tpu.memory_space<vmem>>
    %155 = tpu.memref_slice %arg10[%c1_i32_71] : memref<16x!tpu.dma_semaphore, #tpu.memory_space<semaphore_mem>> -> memref<1x!tpu.dma_semaphore, #tpu.memory_space<semaphore_mem>>
    %156 = tpu.memref_squeeze %155 : memref<1x!tpu.dma_semaphore, #tpu.memory_space<semaphore_mem>> -> memref<!tpu.dma_semaphore, #tpu.memory_space<semaphore_mem>>
    tpu.wait_dma2 semaphore(%156 : memref<!tpu.dma_semaphore, #tpu.memory_space<semaphore_mem>>) src(%152 : memref<32xf32, #tpu.memory_space<any>>) dst(%154 : memref<32xf32, #tpu.memory_space<vmem>>)
    %c0_i32_74 = arith.constant 0 : i32
    %c2_i32_75 = arith.constant 2 : i32
    %c2_i32_76 = arith.constant 2 : i32
    %c0_i32_77 = arith.constant 0 : i32
    %157 = tpu.memref_slice %arg2[%c0_i32_74, %c0_i32_77] : memref<50x32xf32, #tpu.memory_space<any>> -> memref<1x32xf32, #tpu.memory_space<any>>
    %158 = tpu.memref_squeeze %157 : memref<1x32xf32, #tpu.memory_space<any>> -> memref<32xf32, #tpu.memory_space<any>>
    %c0_i32_78 = arith.constant 0 : i32
    %159 = tpu.memref_slice %arg9[%c2_i32_75, %c0_i32_78] : memref<16x32xf32, #tpu.memory_space<vmem>> -> memref<1x32xf32, #tpu.memory_space<vmem>>
    %160 = tpu.memref_squeeze %159 : memref<1x32xf32, #tpu.memory_space<vmem>> -> memref<32xf32, #tpu.memory_space<vmem>>
    %161 = tpu.memref_slice %arg10[%c2_i32_76] : memref<16x!tpu.dma_semaphore, #tpu.memory_space<semaphore_mem>> -> memref<1x!tpu.dma_semaphore, #tpu.memory_space<semaphore_mem>>
    %162 = tpu.memref_squeeze %161 : memref<1x!tpu.dma_semaphore, #tpu.memory_space<semaphore_mem>> -> memref<!tpu.dma_semaphore, #tpu.memory_space<semaphore_mem>>
    tpu.wait_dma2 semaphore(%162 : memref<!tpu.dma_semaphore, #tpu.memory_space<semaphore_mem>>) src(%158 : memref<32xf32, #tpu.memory_space<any>>) dst(%160 : memref<32xf32, #tpu.memory_space<vmem>>)
    %c0_i32_79 = arith.constant 0 : i32
    %c3_i32_80 = arith.constant 3 : i32
    %c3_i32_81 = arith.constant 3 : i32
    %c0_i32_82 = arith.constant 0 : i32
    %163 = tpu.memref_slice %arg2[%c0_i32_79, %c0_i32_82] : memref<50x32xf32, #tpu.memory_space<any>> -> memref<1x32xf32, #tpu.memory_space<any>>
    %164 = tpu.memref_squeeze %163 : memref<1x32xf32, #tpu.memory_space<any>> -> memref<32xf32, #tpu.memory_space<any>>
    %c0_i32_83 = arith.constant 0 : i32
    %165 = tpu.memref_slice %arg9[%c3_i32_80, %c0_i32_83] : memref<16x32xf32, #tpu.memory_space<vmem>> -> memref<1x32xf32, #tpu.memory_space<vmem>>
    %166 = tpu.memref_squeeze %165 : memref<1x32xf32, #tpu.memory_space<vmem>> -> memref<32xf32, #tpu.memory_space<vmem>>
    %167 = tpu.memref_slice %arg10[%c3_i32_81] : memref<16x!tpu.dma_semaphore, #tpu.memory_space<semaphore_mem>> -> memref<1x!tpu.dma_semaphore, #tpu.memory_space<semaphore_mem>>
    %168 = tpu.memref_squeeze %167 : memref<1x!tpu.dma_semaphore, #tpu.memory_space<semaphore_mem>> -> memref<!tpu.dma_semaphore, #tpu.memory_space<semaphore_mem>>
    tpu.wait_dma2 semaphore(%168 : memref<!tpu.dma_semaphore, #tpu.memory_space<semaphore_mem>>) src(%164 : memref<32xf32, #tpu.memory_space<any>>) dst(%166 : memref<32xf32, #tpu.memory_space<vmem>>)
    %c0_i32_84 = arith.constant 0 : i32
    %c4_i32_85 = arith.constant 4 : i32
    %c4_i32_86 = arith.constant 4 : i32
    %c0_i32_87 = arith.constant 0 : i32
    %169 = tpu.memref_slice %arg2[%c0_i32_84, %c0_i32_87] : memref<50x32xf32, #tpu.memory_space<any>> -> memref<1x32xf32, #tpu.memory_space<any>>
    %170 = tpu.memref_squeeze %169 : memref<1x32xf32, #tpu.memory_space<any>> -> memref<32xf32, #tpu.memory_space<any>>
    %c0_i32_88 = arith.constant 0 : i32
    %171 = tpu.memref_slice %arg9[%c4_i32_85, %c0_i32_88] : memref<16x32xf32, #tpu.memory_space<vmem>> -> memref<1x32xf32, #tpu.memory_space<vmem>>
    %172 = tpu.memref_squeeze %171 : memref<1x32xf32, #tpu.memory_space<vmem>> -> memref<32xf32, #tpu.memory_space<vmem>>
    %173 = tpu.memref_slice %arg10[%c4_i32_86] : memref<16x!tpu.dma_semaphore, #tpu.memory_space<semaphore_mem>> -> memref<1x!tpu.dma_semaphore, #tpu.memory_space<semaphore_mem>>
    %174 = tpu.memref_squeeze %173 : memref<1x!tpu.dma_semaphore, #tpu.memory_space<semaphore_mem>> -> memref<!tpu.dma_semaphore, #tpu.memory_space<semaphore_mem>>
    tpu.wait_dma2 semaphore(%174 : memref<!tpu.dma_semaphore, #tpu.memory_space<semaphore_mem>>) src(%170 : memref<32xf32, #tpu.memory_space<any>>) dst(%172 : memref<32xf32, #tpu.memory_space<vmem>>)
    %c0_i32_89 = arith.constant 0 : i32
    %c5_i32_90 = arith.constant 5 : i32
    %c5_i32_91 = arith.constant 5 : i32
    %c0_i32_92 = arith.constant 0 : i32
    %175 = tpu.memref_slice %arg2[%c0_i32_89, %c0_i32_92] : memref<50x32xf32, #tpu.memory_space<any>> -> memref<1x32xf32, #tpu.memory_space<any>>
    %176 = tpu.memref_squeeze %175 : memref<1x32xf32, #tpu.memory_space<any>> -> memref<32xf32, #tpu.memory_space<any>>
    %c0_i32_93 = arith.constant 0 : i32
    %177 = tpu.memref_slice %arg9[%c5_i32_90, %c0_i32_93] : memref<16x32xf32, #tpu.memory_space<vmem>> -> memref<1x32xf32, #tpu.memory_space<vmem>>
    %178 = tpu.memref_squeeze %177 : memref<1x32xf32, #tpu.memory_space<vmem>> -> memref<32xf32, #tpu.memory_space<vmem>>
    %179 = tpu.memref_slice %arg10[%c5_i32_91] : memref<16x!tpu.dma_semaphore, #tpu.memory_space<semaphore_mem>> -> memref<1x!tpu.dma_semaphore, #tpu.memory_space<semaphore_mem>>
    %180 = tpu.memref_squeeze %179 : memref<1x!tpu.dma_semaphore, #tpu.memory_space<semaphore_mem>> -> memref<!tpu.dma_semaphore, #tpu.memory_space<semaphore_mem>>
    tpu.wait_dma2 semaphore(%180 : memref<!tpu.dma_semaphore, #tpu.memory_space<semaphore_mem>>) src(%176 : memref<32xf32, #tpu.memory_space<any>>) dst(%178 : memref<32xf32, #tpu.memory_space<vmem>>)
    %c0_i32_94 = arith.constant 0 : i32
    %c6_i32_95 = arith.constant 6 : i32
    %c6_i32_96 = arith.constant 6 : i32
    %c0_i32_97 = arith.constant 0 : i32
    %181 = tpu.memref_slice %arg2[%c0_i32_94, %c0_i32_97] : memref<50x32xf32, #tpu.memory_space<any>> -> memref<1x32xf32, #tpu.memory_space<any>>
    %182 = tpu.memref_squeeze %181 : memref<1x32xf32, #tpu.memory_space<any>> -> memref<32xf32, #tpu.memory_space<any>>
    %c0_i32_98 = arith.constant 0 : i32
    %183 = tpu.memref_slice %arg9[%c6_i32_95, %c0_i32_98] : memref<16x32xf32, #tpu.memory_space<vmem>> -> memref<1x32xf32, #tpu.memory_space<vmem>>
    %184 = tpu.memref_squeeze %183 : memref<1x32xf32, #tpu.memory_space<vmem>> -> memref<32xf32, #tpu.memory_space<vmem>>
    %185 = tpu.memref_slice %arg10[%c6_i32_96] : memref<16x!tpu.dma_semaphore, #tpu.memory_space<semaphore_mem>> -> memref<1x!tpu.dma_semaphore, #tpu.memory_space<semaphore_mem>>
    %186 = tpu.memref_squeeze %185 : memref<1x!tpu.dma_semaphore, #tpu.memory_space<semaphore_mem>> -> memref<!tpu.dma_semaphore, #tpu.memory_space<semaphore_mem>>
    tpu.wait_dma2 semaphore(%186 : memref<!tpu.dma_semaphore, #tpu.memory_space<semaphore_mem>>) src(%182 : memref<32xf32, #tpu.memory_space<any>>) dst(%184 : memref<32xf32, #tpu.memory_space<vmem>>)
    %c0_i32_99 = arith.constant 0 : i32
    %c7_i32_100 = arith.constant 7 : i32
    %c7_i32_101 = arith.constant 7 : i32
    %c0_i32_102 = arith.constant 0 : i32
    %187 = tpu.memref_slice %arg2[%c0_i32_99, %c0_i32_102] : memref<50x32xf32, #tpu.memory_space<any>> -> memref<1x32xf32, #tpu.memory_space<any>>
    %188 = tpu.memref_squeeze %187 : memref<1x32xf32, #tpu.memory_space<any>> -> memref<32xf32, #tpu.memory_space<any>>
    %c0_i32_103 = arith.constant 0 : i32
    %189 = tpu.memref_slice %arg9[%c7_i32_100, %c0_i32_103] : memref<16x32xf32, #tpu.memory_space<vmem>> -> memref<1x32xf32, #tpu.memory_space<vmem>>
    %190 = tpu.memref_squeeze %189 : memref<1x32xf32, #tpu.memory_space<vmem>> -> memref<32xf32, #tpu.memory_space<vmem>>
    %191 = tpu.memref_slice %arg10[%c7_i32_101] : memref<16x!tpu.dma_semaphore, #tpu.memory_space<semaphore_mem>> -> memref<1x!tpu.dma_semaphore, #tpu.memory_space<semaphore_mem>>
    %192 = tpu.memref_squeeze %191 : memref<1x!tpu.dma_semaphore, #tpu.memory_space<semaphore_mem>> -> memref<!tpu.dma_semaphore, #tpu.memory_space<semaphore_mem>>
    tpu.wait_dma2 semaphore(%192 : memref<!tpu.dma_semaphore, #tpu.memory_space<semaphore_mem>>) src(%188 : memref<32xf32, #tpu.memory_space<any>>) dst(%190 : memref<32xf32, #tpu.memory_space<vmem>>)
    %c0_i32_104 = arith.constant 0 : i32
    %c8_i32_105 = arith.constant 8 : i32
    %c8_i32_106 = arith.constant 8 : i32
    %c0_i32_107 = arith.constant 0 : i32
    %193 = tpu.memref_slice %arg2[%c0_i32_104, %c0_i32_107] : memref<50x32xf32, #tpu.memory_space<any>> -> memref<1x32xf32, #tpu.memory_space<any>>
    %194 = tpu.memref_squeeze %193 : memref<1x32xf32, #tpu.memory_space<any>> -> memref<32xf32, #tpu.memory_space<any>>
    %c0_i32_108 = arith.constant 0 : i32
    %195 = tpu.memref_slice %arg9[%c8_i32_105, %c0_i32_108] : memref<16x32xf32, #tpu.memory_space<vmem>> -> memref<1x32xf32, #tpu.memory_space<vmem>>
    %196 = tpu.memref_squeeze %195 : memref<1x32xf32, #tpu.memory_space<vmem>> -> memref<32xf32, #tpu.memory_space<vmem>>
    %197 = tpu.memref_slice %arg10[%c8_i32_106] : memref<16x!tpu.dma_semaphore, #tpu.memory_space<semaphore_mem>> -> memref<1x!tpu.dma_semaphore, #tpu.memory_space<semaphore_mem>>
    %198 = tpu.memref_squeeze %197 : memref<1x!tpu.dma_semaphore, #tpu.memory_space<semaphore_mem>> -> memref<!tpu.dma_semaphore, #tpu.memory_space<semaphore_mem>>
    tpu.wait_dma2 semaphore(%198 : memref<!tpu.dma_semaphore, #tpu.memory_space<semaphore_mem>>) src(%194 : memref<32xf32, #tpu.memory_space<any>>) dst(%196 : memref<32xf32, #tpu.memory_space<vmem>>)
    %c0_i32_109 = arith.constant 0 : i32
    %c9_i32_110 = arith.constant 9 : i32
    %c9_i32_111 = arith.constant 9 : i32
    %c0_i32_112 = arith.constant 0 : i32
    %199 = tpu.memref_slice %arg2[%c0_i32_109, %c0_i32_112] : memref<50x32xf32, #tpu.memory_space<any>> -> memref<1x32xf32, #tpu.memory_space<any>>
    %200 = tpu.memref_squeeze %199 : memref<1x32xf32, #tpu.memory_space<any>> -> memref<32xf32, #tpu.memory_space<any>>
    %c0_i32_113 = arith.constant 0 : i32
    %201 = tpu.memref_slice %arg9[%c9_i32_110, %c0_i32_113] : memref<16x32xf32, #tpu.memory_space<vmem>> -> memref<1x32xf32, #tpu.memory_space<vmem>>
    %202 = tpu.memref_squeeze %201 : memref<1x32xf32, #tpu.memory_space<vmem>> -> memref<32xf32, #tpu.memory_space<vmem>>
    %203 = tpu.memref_slice %arg10[%c9_i32_111] : memref<16x!tpu.dma_semaphore, #tpu.memory_space<semaphore_mem>> -> memref<1x!tpu.dma_semaphore, #tpu.memory_space<semaphore_mem>>
    %204 = tpu.memref_squeeze %203 : memref<1x!tpu.dma_semaphore, #tpu.memory_space<semaphore_mem>> -> memref<!tpu.dma_semaphore, #tpu.memory_space<semaphore_mem>>
    tpu.wait_dma2 semaphore(%204 : memref<!tpu.dma_semaphore, #tpu.memory_space<semaphore_mem>>) src(%200 : memref<32xf32, #tpu.memory_space<any>>) dst(%202 : memref<32xf32, #tpu.memory_space<vmem>>)
    %c0_i32_114 = arith.constant 0 : i32
    %c10_i32_115 = arith.constant 10 : i32
    %c10_i32_116 = arith.constant 10 : i32
    %c0_i32_117 = arith.constant 0 : i32
    %205 = tpu.memref_slice %arg2[%c0_i32_114, %c0_i32_117] : memref<50x32xf32, #tpu.memory_space<any>> -> memref<1x32xf32, #tpu.memory_space<any>>
    %206 = tpu.memref_squeeze %205 : memref<1x32xf32, #tpu.memory_space<any>> -> memref<32xf32, #tpu.memory_space<any>>
    %c0_i32_118 = arith.constant 0 : i32
    %207 = tpu.memref_slice %arg9[%c10_i32_115, %c0_i32_118] : memref<16x32xf32, #tpu.memory_space<vmem>> -> memref<1x32xf32, #tpu.memory_space<vmem>>
    %208 = tpu.memref_squeeze %207 : memref<1x32xf32, #tpu.memory_space<vmem>> -> memref<32xf32, #tpu.memory_space<vmem>>
    %209 = tpu.memref_slice %arg10[%c10_i32_116] : memref<16x!tpu.dma_semaphore, #tpu.memory_space<semaphore_mem>> -> memref<1x!tpu.dma_semaphore, #tpu.memory_space<semaphore_mem>>
    %210 = tpu.memref_squeeze %209 : memref<1x!tpu.dma_semaphore, #tpu.memory_space<semaphore_mem>> -> memref<!tpu.dma_semaphore, #tpu.memory_space<semaphore_mem>>
    tpu.wait_dma2 semaphore(%210 : memref<!tpu.dma_semaphore, #tpu.memory_space<semaphore_mem>>) src(%206 : memref<32xf32, #tpu.memory_space<any>>) dst(%208 : memref<32xf32, #tpu.memory_space<vmem>>)
    %c0_i32_119 = arith.constant 0 : i32
    %c11_i32_120 = arith.constant 11 : i32
    %c11_i32_121 = arith.constant 11 : i32
    %c0_i32_122 = arith.constant 0 : i32
    %211 = tpu.memref_slice %arg2[%c0_i32_119, %c0_i32_122] : memref<50x32xf32, #tpu.memory_space<any>> -> memref<1x32xf32, #tpu.memory_space<any>>
    %212 = tpu.memref_squeeze %211 : memref<1x32xf32, #tpu.memory_space<any>> -> memref<32xf32, #tpu.memory_space<any>>
    %c0_i32_123 = arith.constant 0 : i32
    %213 = tpu.memref_slice %arg9[%c11_i32_120, %c0_i32_123] : memref<16x32xf32, #tpu.memory_space<vmem>> -> memref<1x32xf32, #tpu.memory_space<vmem>>
    %214 = tpu.memref_squeeze %213 : memref<1x32xf32, #tpu.memory_space<vmem>> -> memref<32xf32, #tpu.memory_space<vmem>>
    %215 = tpu.memref_slice %arg10[%c11_i32_121] : memref<16x!tpu.dma_semaphore, #tpu.memory_space<semaphore_mem>> -> memref<1x!tpu.dma_semaphore, #tpu.memory_space<semaphore_mem>>
    %216 = tpu.memref_squeeze %215 : memref<1x!tpu.dma_semaphore, #tpu.memory_space<semaphore_mem>> -> memref<!tpu.dma_semaphore, #tpu.memory_space<semaphore_mem>>
    tpu.wait_dma2 semaphore(%216 : memref<!tpu.dma_semaphore, #tpu.memory_space<semaphore_mem>>) src(%212 : memref<32xf32, #tpu.memory_space<any>>) dst(%214 : memref<32xf32, #tpu.memory_space<vmem>>)
    %c0_i32_124 = arith.constant 0 : i32
    %c12_i32_125 = arith.constant 12 : i32
    %c12_i32_126 = arith.constant 12 : i32
    %c0_i32_127 = arith.constant 0 : i32
    %217 = tpu.memref_slice %arg2[%c0_i32_124, %c0_i32_127] : memref<50x32xf32, #tpu.memory_space<any>> -> memref<1x32xf32, #tpu.memory_space<any>>
    %218 = tpu.memref_squeeze %217 : memref<1x32xf32, #tpu.memory_space<any>> -> memref<32xf32, #tpu.memory_space<any>>
    %c0_i32_128 = arith.constant 0 : i32
    %219 = tpu.memref_slice %arg9[%c12_i32_125, %c0_i32_128] : memref<16x32xf32, #tpu.memory_space<vmem>> -> memref<1x32xf32, #tpu.memory_space<vmem>>
    %220 = tpu.memref_squeeze %219 : memref<1x32xf32, #tpu.memory_space<vmem>> -> memref<32xf32, #tpu.memory_space<vmem>>
    %221 = tpu.memref_slice %arg10[%c12_i32_126] : memref<16x!tpu.dma_semaphore, #tpu.memory_space<semaphore_mem>> -> memref<1x!tpu.dma_semaphore, #tpu.memory_space<semaphore_mem>>
    %222 = tpu.memref_squeeze %221 : memref<1x!tpu.dma_semaphore, #tpu.memory_space<semaphore_mem>> -> memref<!tpu.dma_semaphore, #tpu.memory_space<semaphore_mem>>
    tpu.wait_dma2 semaphore(%222 : memref<!tpu.dma_semaphore, #tpu.memory_space<semaphore_mem>>) src(%218 : memref<32xf32, #tpu.memory_space<any>>) dst(%220 : memref<32xf32, #tpu.memory_space<vmem>>)
    %c0_i32_129 = arith.constant 0 : i32
    %c13_i32_130 = arith.constant 13 : i32
    %c13_i32_131 = arith.constant 13 : i32
    %c0_i32_132 = arith.constant 0 : i32
    %223 = tpu.memref_slice %arg2[%c0_i32_129, %c0_i32_132] : memref<50x32xf32, #tpu.memory_space<any>> -> memref<1x32xf32, #tpu.memory_space<any>>
    %224 = tpu.memref_squeeze %223 : memref<1x32xf32, #tpu.memory_space<any>> -> memref<32xf32, #tpu.memory_space<any>>
    %c0_i32_133 = arith.constant 0 : i32
    %225 = tpu.memref_slice %arg9[%c13_i32_130, %c0_i32_133] : memref<16x32xf32, #tpu.memory_space<vmem>> -> memref<1x32xf32, #tpu.memory_space<vmem>>
    %226 = tpu.memref_squeeze %225 : memref<1x32xf32, #tpu.memory_space<vmem>> -> memref<32xf32, #tpu.memory_space<vmem>>
    %227 = tpu.memref_slice %arg10[%c13_i32_131] : memref<16x!tpu.dma_semaphore, #tpu.memory_space<semaphore_mem>> -> memref<1x!tpu.dma_semaphore, #tpu.memory_space<semaphore_mem>>
    %228 = tpu.memref_squeeze %227 : memref<1x!tpu.dma_semaphore, #tpu.memory_space<semaphore_mem>> -> memref<!tpu.dma_semaphore, #tpu.memory_space<semaphore_mem>>
    tpu.wait_dma2 semaphore(%228 : memref<!tpu.dma_semaphore, #tpu.memory_space<semaphore_mem>>) src(%224 : memref<32xf32, #tpu.memory_space<any>>) dst(%226 : memref<32xf32, #tpu.memory_space<vmem>>)
    %c0_i32_134 = arith.constant 0 : i32
    %c14_i32_135 = arith.constant 14 : i32
    %c14_i32_136 = arith.constant 14 : i32
    %c0_i32_137 = arith.constant 0 : i32
    %229 = tpu.memref_slice %arg2[%c0_i32_134, %c0_i32_137] : memref<50x32xf32, #tpu.memory_space<any>> -> memref<1x32xf32, #tpu.memory_space<any>>
    %230 = tpu.memref_squeeze %229 : memref<1x32xf32, #tpu.memory_space<any>> -> memref<32xf32, #tpu.memory_space<any>>
    %c0_i32_138 = arith.constant 0 : i32
    %231 = tpu.memref_slice %arg9[%c14_i32_135, %c0_i32_138] : memref<16x32xf32, #tpu.memory_space<vmem>> -> memref<1x32xf32, #tpu.memory_space<vmem>>
    %232 = tpu.memref_squeeze %231 : memref<1x32xf32, #tpu.memory_space<vmem>> -> memref<32xf32, #tpu.memory_space<vmem>>
    %233 = tpu.memref_slice %arg10[%c14_i32_136] : memref<16x!tpu.dma_semaphore, #tpu.memory_space<semaphore_mem>> -> memref<1x!tpu.dma_semaphore, #tpu.memory_space<semaphore_mem>>
    %234 = tpu.memref_squeeze %233 : memref<1x!tpu.dma_semaphore, #tpu.memory_space<semaphore_mem>> -> memref<!tpu.dma_semaphore, #tpu.memory_space<semaphore_mem>>
    tpu.wait_dma2 semaphore(%234 : memref<!tpu.dma_semaphore, #tpu.memory_space<semaphore_mem>>) src(%230 : memref<32xf32, #tpu.memory_space<any>>) dst(%232 : memref<32xf32, #tpu.memory_space<vmem>>)
    %c0_i32_139 = arith.constant 0 : i32
    %c15_i32_140 = arith.constant 15 : i32
    %c15_i32_141 = arith.constant 15 : i32
    %c0_i32_142 = arith.constant 0 : i32
    %235 = tpu.memref_slice %arg2[%c0_i32_139, %c0_i32_142] : memref<50x32xf32, #tpu.memory_space<any>> -> memref<1x32xf32, #tpu.memory_space<any>>
    %236 = tpu.memref_squeeze %235 : memref<1x32xf32, #tpu.memory_space<any>> -> memref<32xf32, #tpu.memory_space<any>>
    %c0_i32_143 = arith.constant 0 : i32
    %237 = tpu.memref_slice %arg9[%c15_i32_140, %c0_i32_143] : memref<16x32xf32, #tpu.memory_space<vmem>> -> memref<1x32xf32, #tpu.memory_space<vmem>>
    %238 = tpu.memref_squeeze %237 : memref<1x32xf32, #tpu.memory_space<vmem>> -> memref<32xf32, #tpu.memory_space<vmem>>
    %239 = tpu.memref_slice %arg10[%c15_i32_141] : memref<16x!tpu.dma_semaphore, #tpu.memory_space<semaphore_mem>> -> memref<1x!tpu.dma_semaphore, #tpu.memory_space<semaphore_mem>>
    %240 = tpu.memref_squeeze %239 : memref<1x!tpu.dma_semaphore, #tpu.memory_space<semaphore_mem>> -> memref<!tpu.dma_semaphore, #tpu.memory_space<semaphore_mem>>
    tpu.wait_dma2 semaphore(%240 : memref<!tpu.dma_semaphore, #tpu.memory_space<semaphore_mem>>) src(%236 : memref<32xf32, #tpu.memory_space<any>>) dst(%238 : memref<32xf32, #tpu.memory_space<vmem>>)
    %c0 = arith.constant 0 : index
    %c0_144 = arith.constant 0 : index
    %241 = vector.load %arg9[%c0, %c0_144] : memref<16x32xf32, #tpu.memory_space<vmem>>, vector<16x32xf32>
    %242 = arith.truncf %241 : vector<16x32xf32> to vector<16x32xbf16>
    %c0_145 = arith.constant 0 : index
    %c0_146 = arith.constant 0 : index
    %c0_147 = arith.constant 0 : index
    %243 = vector.load %arg3[%c0_145, %c0_146, %c0_147] : memref<5x32x128xbf16, #tpu.memory_space<vmem>>, vector<1x32x128xbf16>
    %244 = vector.shape_cast %243 : vector<1x32x128xbf16> to vector<32x128xbf16>
    %cst = arith.constant dense<0.000000e+00> : vector<16x128xf32>
    %245 = tpu.matmul %242, %244, %cst {dimension_numbers = #tpu.dot_dimension_numbers<[1], [0], [0], [1], [0, 0, 1, 1], [], []>} : vector<16x32xbf16>, vector<32x128xbf16>, vector<16x128xf32> -> vector<16x128xf32>
    %c15_i32_148 = arith.constant 15 : i32
    %246 = tpu.dynamic_rotate %241 by %c15_i32_148 dim 0 : vector<16x32xf32>, i32 -> vector<16x32xf32>
    %247 = arith.truncf %246 : vector<16x32xf32> to vector<16x32xbf16>
    %c1 = arith.constant 1 : index
    %c0_149 = arith.constant 0 : index
    %c0_150 = arith.constant 0 : index
    %248 = vector.load %arg3[%c1, %c0_149, %c0_150] : memref<5x32x128xbf16, #tpu.memory_space<vmem>>, vector<1x32x128xbf16>
    %249 = vector.shape_cast %248 : vector<1x32x128xbf16> to vector<32x128xbf16>
    %cst_151 = arith.constant dense<0.000000e+00> : vector<16x128xf32>
    %250 = tpu.matmul %247, %249, %cst_151 {dimension_numbers = #tpu.dot_dimension_numbers<[1], [0], [0], [1], [0, 0, 1, 1], [], []>} : vector<16x32xbf16>, vector<32x128xbf16>, vector<16x128xf32> -> vector<16x128xf32>
    %251 = arith.addf %245, %250 : vector<16x128xf32>
    %c14_i32_152 = arith.constant 14 : i32
    %252 = tpu.dynamic_rotate %241 by %c14_i32_152 dim 0 : vector<16x32xf32>, i32 -> vector<16x32xf32>
    %253 = arith.truncf %252 : vector<16x32xf32> to vector<16x32xbf16>
    %c2 = arith.constant 2 : index
    %c0_153 = arith.constant 0 : index
    %c0_154 = arith.constant 0 : index
    %254 = vector.load %arg3[%c2, %c0_153, %c0_154] : memref<5x32x128xbf16, #tpu.memory_space<vmem>>, vector<1x32x128xbf16>
    %255 = vector.shape_cast %254 : vector<1x32x128xbf16> to vector<32x128xbf16>
    %cst_155 = arith.constant dense<0.000000e+00> : vector<16x128xf32>
    %256 = tpu.matmul %253, %255, %cst_155 {dimension_numbers = #tpu.dot_dimension_numbers<[1], [0], [0], [1], [0, 0, 1, 1], [], []>} : vector<16x32xbf16>, vector<32x128xbf16>, vector<16x128xf32> -> vector<16x128xf32>
    %257 = arith.addf %251, %256 : vector<16x128xf32>
    %c13_i32_156 = arith.constant 13 : i32
    %258 = tpu.dynamic_rotate %241 by %c13_i32_156 dim 0 : vector<16x32xf32>, i32 -> vector<16x32xf32>
    %259 = arith.truncf %258 : vector<16x32xf32> to vector<16x32xbf16>
    %c3 = arith.constant 3 : index
    %c0_157 = arith.constant 0 : index
    %c0_158 = arith.constant 0 : index
    %260 = vector.load %arg3[%c3, %c0_157, %c0_158] : memref<5x32x128xbf16, #tpu.memory_space<vmem>>, vector<1x32x128xbf16>
    %261 = vector.shape_cast %260 : vector<1x32x128xbf16> to vector<32x128xbf16>
    %cst_159 = arith.constant dense<0.000000e+00> : vector<16x128xf32>
    %262 = tpu.matmul %259, %261, %cst_159 {dimension_numbers = #tpu.dot_dimension_numbers<[1], [0], [0], [1], [0, 0, 1, 1], [], []>} : vector<16x32xbf16>, vector<32x128xbf16>, vector<16x128xf32> -> vector<16x128xf32>
    %263 = arith.addf %257, %262 : vector<16x128xf32>
    %c12_i32_160 = arith.constant 12 : i32
    %264 = tpu.dynamic_rotate %241 by %c12_i32_160 dim 0 : vector<16x32xf32>, i32 -> vector<16x32xf32>
    %265 = arith.truncf %264 : vector<16x32xf32> to vector<16x32xbf16>
    %c4 = arith.constant 4 : index
    %c0_161 = arith.constant 0 : index
    %c0_162 = arith.constant 0 : index
    %266 = vector.load %arg3[%c4, %c0_161, %c0_162] : memref<5x32x128xbf16, #tpu.memory_space<vmem>>, vector<1x32x128xbf16>
    %267 = vector.shape_cast %266 : vector<1x32x128xbf16> to vector<32x128xbf16>
    %cst_163 = arith.constant dense<0.000000e+00> : vector<16x128xf32>
    %268 = tpu.matmul %265, %267, %cst_163 {dimension_numbers = #tpu.dot_dimension_numbers<[1], [0], [0], [1], [0, 0, 1, 1], [], []>} : vector<16x32xbf16>, vector<32x128xbf16>, vector<16x128xf32> -> vector<16x128xf32>
    %269 = arith.addf %263, %268 : vector<16x128xf32>
    %c0_164 = arith.constant 0 : index
    %c0_165 = arith.constant 0 : index
    %270 = vector.load %arg4[%c0_164, %c0_165] : memref<1x128xf32, #tpu.memory_space<vmem>>, vector<1x128xf32>
    %271 = vector.broadcast %270 : vector<1x128xf32> to vector<16x128xf32>
    %272 = arith.addf %269, %271 : vector<16x128xf32>
    %cst_166 = arith.constant 0.000000e+00 : f32
    %273 = vector.broadcast %cst_166 : f32 to vector<16x128xf32>
    %274 = arith.maximumf %272, %273 : vector<16x128xf32>
    %275 = vector.shape_cast %274 : vector<16x128xf32> to vector<1x16x128xf32>
    %c0_167 = arith.constant 0 : index
    %c0_168 = arith.constant 0 : index
    %276 = vector.load %arg5[%c0_167, %c0_168] : memref<16x128xf32, #tpu.memory_space<vmem>>, vector<16x128xf32>
    %277 = vector.shape_cast %276 : vector<16x128xf32> to vector<1x16x128xf32>
    %278 = arith.addf %275, %277 : vector<1x16x128xf32>
    %cst_169 = arith.constant dense<0xFF800000> : vector<1x128xf32>
    %279 = vector.multi_reduction <maximumf>, %278, %cst_169 [1] : vector<1x16x128xf32> to vector<1x128xf32>
    %280 = arith.truncf %279 : vector<1x128xf32> to vector<1x128xbf16>
    %c0_170 = arith.constant 0 : index
    %c0_171 = arith.constant 0 : index
    %281 = vector.load %arg6[%c0_170, %c0_171] : memref<128x128xbf16, #tpu.memory_space<vmem>>, vector<128x128xbf16>
    %cst_172 = arith.constant dense<0.000000e+00> : vector<1x128xf32>
    %282 = tpu.matmul %280, %281, %cst_172 {dimension_numbers = #tpu.dot_dimension_numbers<[1], [0], [0], [1], [0, 0, 1, 1], [], []>} : vector<1x128xbf16>, vector<128x128xbf16>, vector<1x128xf32> -> vector<1x128xf32>
    %c0_173 = arith.constant 0 : index
    %c0_174 = arith.constant 0 : index
    %283 = vector.load %arg7[%c0_173, %c0_174] : memref<1x128xf32, #tpu.memory_space<vmem>>, vector<1x128xf32>
    %284 = arith.addf %282, %283 : vector<1x128xf32>
    %c0_175 = arith.constant 0 : index
    %c0_176 = arith.constant 0 : index
    %c0_177 = arith.constant 0 : index
    %285 = vector.load %arg8[%c0_175, %c0_176, %c0_177] : memref<1x1x128xf32, #tpu.memory_space<vmem>>, vector<1x1x128xf32>
    %286 = vector.shape_cast %285 : vector<1x1x128xf32> to vector<1x128xf32>
    %287 = vector.shape_cast %284 : vector<1x128xf32> to vector<1x1x128xf32>
    tpu.vector_store %arg8[%c0_175, %c0_176, %c0_177], %287 {strides = array<i32>} : memref<1x1x128xf32, #tpu.memory_space<vmem>>, vector<1x1x128xf32>,
    return
  }
  func.func @transform_1(%arg0: i32, %arg1: memref<32xi32, #tpu.memory_space<smem>>) -> (i32, i32, i32) {
    %c0_i32 = arith.constant 0 : i32
    %c0_i32_0 = arith.constant 0 : i32
    %c0_i32_1 = arith.constant 0 : i32
    %c0_i32_2 = arith.constant 0 : i32
    return %c0_i32, %c0_i32_0, %c0_i32_1 : i32, i32, i32
  }
  func.func @transform_2(%arg0: i32, %arg1: memref<32xi32, #tpu.memory_space<smem>>) -> (i32, i32) {
    %c0_i32 = arith.constant 0 : i32
    %c0_i32_0 = arith.constant 0 : i32
    %c0_i32_1 = arith.constant 0 : i32
    return %c0_i32, %c0_i32_0 : i32, i32
  }
  func.func @transform_3(%arg0: i32, %arg1: memref<32xi32, #tpu.memory_space<smem>>) -> (i32, i32) {
    %c0_i32 = arith.constant 0 : i32
    %c0_i32_0 = arith.constant 0 : i32
    %c0_i32_1 = arith.constant 0 : i32
    return %c0_i32, %c0_i32_0 : i32, i32
  }
  func.func @transform_4(%arg0: i32, %arg1: memref<32xi32, #tpu.memory_space<smem>>) -> (i32, i32) {
    %c0_i32 = arith.constant 0 : i32
    %c0_i32_0 = arith.constant 0 : i32
    %c0_i32_1 = arith.constant 0 : i32
    return %c0_i32, %c0_i32_0 : i32, i32
  }
  func.func @transform_5(%arg0: i32, %arg1: memref<32xi32, #tpu.memory_space<smem>>) -> (i32, i32) {
    %c0_i32 = arith.constant 0 : i32
    %c0_i32_0 = arith.constant 0 : i32
    %c0_i32_1 = arith.constant 0 : i32
    return %c0_i32, %c0_i32_0 : i32, i32
  }
  func.func @transform_6(%arg0: i32, %arg1: memref<32xi32, #tpu.memory_space<smem>>) -> (i32, i32, i32) {
    %c0_i32 = arith.constant 0 : i32
    %c0_i32_0 = arith.constant 0 : i32
    %c0_i32_1 = arith.constant 0 : i32
    return %arg0, %c0_i32, %c0_i32_0 : i32, i32, i32
  }
}

</mosaic_0001>

<bundles_post_ra>
// kernel: tpu_custom_call.1
= control target key start
LH: loop header
LB: loop body
LE: loop exit
PB: predicated region body
PF: predicated region fallthrough
CT: control target
= control target key end

     0   :  { %s1855_s27 = smov [#allocation5]   ;;  %s2128_s0 = inlined_call_operand.vmem [shape: s32[32], index: 0, kind: input, shape index: {}]   ;;  %s2129_s1 = inlined_call_operand.vmem [shape: f32[50,32], index: 1, kind: input, shape index: {}]   ;;  %s2130_s2 = inlined_call_operand.vmem [shape: bf16[5,32,128], index: 2, kind: input, shape index: {}]   ;;  %s2131_s3 = inlined_call_operand.vmem [shape: f32[1,128], index: 3, kind: input, shape index: {}]   ;;  %s2132_s4 = inlined_call_operand.hbm [shape: f32[16,128], index: 4, kind: input, shape index: {}]   ;;  %s2133_s5 = inlined_call_operand.hbm [shape: bf16[128,128], index: 5, kind: input, shape index: {}]   ;;  %s2134_s6 = inlined_call_operand.vmem [shape: f32[1,128], index: 6, kind: input, shape index: {}]   ;;  %s2135_s7 = inlined_call_operand.hbm [shape: f32[2,1,128], index: 7, kind: output, shape index: {}]  }
   0x1   :  { %s13_s26 = sshll.u32 %s2128_s0, 4  ;;  %s14_s26 = int_to_ptr.vmem [resolvable:$true] %s13_s26 }
   0x2   :  { %16 = dma.vmem_to_smem %s14_s26, 16, %s1855_s27, [#allocation4] }
   0x3   :  { %1793 = dma.done.wait [#allocation4], 16 }
   0x4   :  { %1794 = vsyncadd [#allocation4], 4294967280 }
   0x5   :  { %19 = sfence }
   0x6   :  { %20 = vsyncpa [#allocation7], 0 }
   0x7   :  { %21 = vsyncpa [#allocation10], 0 }
   0x8   :  { %22 = vsyncpa [#allocation8], 0 }
   0x9   :  { %24 = vsyncpa [#allocation8 + $0x1], 0  ;;  %s1905_s28 = smov 0   ;;  %s1907_s29 = smov 0  }
   0xa   :  { %s1909_s30 = smov 0   ;;  %s1911_s8 = smov 0  }
   0xb LB: > { %s1926_s0 = sadd.s32 4294967295, %s1853_s8   ;;  %s1474_s9 = sadd.s32 4294967294, %s1853_s8   ;;  %s1853_s8 = sphi %s1911_s8, %s2144_s8   ;;  %s1849_s30 = sphi %s1909_s30, %s2143_s30   ;;  %s1845_s29 = sphi %s1907_s29, %s2142_s29   ;;  %s1841_s28 = sphi %s1905_s28, %s2141_s28  }
   0xc   : > { %s1930_s10 = sadd.s32 1, %s1853_s8   ;;  %s142_s11 = sadd.s32 1, %s1849_s30 }
   0xd   : > { %s139_s12 = ssub.s32 %s1853_s8, %s1930_s10  ;;  %p152_p0 = scmp.ne.s32.totalorder %s1849_s30, %s1845_s29 }
   0xe   : > { %p140_p1 = scmp.eq.s32.totalorder %s139_s12, 0  ;;  %p153_p2 = scmp.eq.s32.totalorder %s1926_s0, 1 }
   0xf   : > { %p158_p3 = scmp.ne.s32.totalorder %s1845_s29, %s1841_s28  ;;  %p159_p4 = scmp.eq.s32.totalorder %s1474_s9, 1 }
  0x10   : > { %s1941_s13 = scalar_select %p140_p1, %s1849_s30, %s142_s11  }
  0x11   : > { %p1943_p5 = por %p153_p2, %p152_p0  ;;  %p1947_p6 = por %p159_p4, %p158_p3 }
  0x12   : > { %p1475_p7 = scmp.ge.s32.totalorder %s1853_s8, 1  ;;  %p166_p8 = scmp.lt.s32.totalorder %s1853_s8, 3 }
  0x13   : > { %p1632_p9 = scmp.eq.s32.totalorder %s1926_s0, 0  ;;  %s183_s19 = sshll.u32 %s2132_s4, 4  ;;  %s184_s19 = int_to_ptr.hbm [resolvable:$true] %s183_s19 }
  0x14   : > { %p1954_p10 = pnand %p1475_p7, %p166_p8  ;;  %s1856_s20 = smov [#allocation6]  }
  0x15   : > { %s185_s21 = sshll.u32 %s1856_s20, 4  ;;  %s197_s24 = sshll.u32 %s2133_s5, 4  ;;  %s186_s21 = int_to_ptr.vmem [resolvable:$true] %s185_s21  ;;  %s198_s24 = int_to_ptr.hbm [resolvable:$true] %s197_s24 }
  0x16   : > { %p1621_p11 = pneg %p1954_p10  ;;  %s1857_s25 = smov 128  }
  0x17   : > { %s1858_s26 = smov 8   ;;  %s1859_s27 = smov [#allocation9]  }
  0x18   : > { %p1622_p12 = pnand %p1632_p9, %p1621_p11  ;;  %s199_s9 = sshll.u32 %s1859_s27, 4  ;;  %s200_s9 = int_to_ptr.vmem [resolvable:$true] %s199_s9 }
  0x19   : > { %s1860_s11 = smov 64   ;;  %s1861_s12 = smov 4  }
  0x1a   : > { %1624 = dma.hbm_to_vmem [thread:$0]  (!%p1622_p12), %s184_s19, 256, %s186_s21, [#allocation7], %s1857_s25, %s1857_s25, %s1858_s26  }
  0x1b   : > { %1627 = dma.hbm_to_vmem [thread:$0]  (!%p1622_p12), %s198_s24, 1024, %s200_s9, [#allocation10], %s1860_s11, %s1860_s11, %s1861_s12  }
  0x1c   : > { %218 = sbr.rel (%p1954_p10) target bundleno = 554 (0x22a), region = 40 }
  0x21   : > { %1796 = dma.done.wait (%p1632_p9), [#allocation7], 256  }
  0x22   : > { %1798 = vsyncadd (%p1632_p9), [#allocation7], 4294967040 }
  0x23   : > { %1800 = dma.done.wait (%p1632_p9), [#allocation10], 1024  }
  0x24   : > { %1802 = vsyncadd (%p1632_p9), [#allocation10], 4294966272  ;;  %s1979_s17 = sshll.u32 %s1926_s0, 4  ;;  %s2136_s16 = sand.u32 1, %s1845_s29  }
  0x25   : > { %s248_s18 = sld [smem:[#allocation5 + %s1979_s17]]  ;;  %s1988_s22 = scalar_lea.vmem [#allocation11], %s2136_s16 }
  0x2b   : > { %s249_s21 = scalar_lea.vmem %s2129_s1, %s248_s18 }
  0x2c   : > { %v264_v0 = vld [vmem:[%s249_s21] sm:$0x1] }
  0x2d   : > { %265 = vst [vmem:[#allocation2] sm:$0x1] %v264_v0 }
  0x2e   : > { %283 = vsyncadd [#allocation3], 16  ;;  %s284_s23 = sadd.s32 1, %s1979_s17 }
  0x2f   : > { %s285_s24 = sld [smem:[#allocation5 + %s284_s23]] }
  0x35   : > { %s286_s27 = scalar_lea.vmem %s2129_s1, %s285_s24 }
  0x36   : > { %v303_v1 = vld [vmem:[%s286_s27] sm:$0x1] }
  0x37   : > { %304 = vst [vmem:[#allocation2 + $0x1] sm:$0x1] %v303_v1 }
  0x38   : > { %322 = vsyncadd [#allocation3 + $0x1], 16  ;;  %s323_s9 = sadd.s32 2, %s1979_s17 }
  0x39   : > { %s324_s11 = sld [smem:[#allocation5 + %s323_s9]] }
  0x3f   : > { %s325_s19 = scalar_lea.vmem %s2129_s1, %s324_s11 }
  0x40   : > { %v342_v2 = vld [vmem:[%s325_s19] sm:$0x1] }
  0x41   : > { %343 = vst [vmem:[#allocation2 + $0x2] sm:$0x1] %v342_v2 }
  0x42   : > { %361 = vsyncadd [#allocation3 + $0x2], 16  ;;  %s362_s20 = sadd.s32 3, %s1979_s17 }
  0x43   : > { %s363_s21 = sld [smem:[#allocation5 + %s362_s20]] }
  0x49   : > { %s364_s24 = scalar_lea.vmem %s2129_s1, %s363_s21 }
  0x4a   : > { %v381_v3 = vld [vmem:[%s364_s24] sm:$0x1] }
  0x4b   : > { %382 = vst [vmem:[#allocation2 + $0x3] sm:$0x1] %v381_v3 }
  0x4c   : > { %400 = vsyncadd [#allocation3 + $0x3], 16  ;;  %s401_s25 = sadd.s32 4, %s1979_s17 }
  0x4d   : > { %s402_s26 = sld [smem:[#allocation5 + %s401_s25]] }
  0x53   : > { %s403_s11 = scalar_lea.vmem %s2129_s1, %s402_s26 }
  0x54   : > { %v420_v4 = vld [vmem:[%s403_s11] sm:$0x1] }
  0x55   : > { %421 = vst [vmem:[#allocation2 + $0x4] sm:$0x1] %v420_v4 }
  0x56   : > { %439 = vsyncadd [#allocation3 + $0x4], 16  ;;  %s440_s12 = sadd.s32 5, %s1979_s17 }
  0x57   : > { %s441_s18 = sld [smem:[#allocation5 + %s440_s12]] }
  0x5d   : > { %s442_s16 = scalar_lea.vmem %s2129_s1, %s441_s18 }
  0x5e   : > { %v459_v5 = vld [vmem:[%s442_s16] sm:$0x1] }
  0x5f   : > { %460 = vst [vmem:[#allocation2 + $0x5] sm:$0x1] %v459_v5 }
  0x60   : > { %478 = vsyncadd [#allocation3 + $0x5], 16  ;;  %s479_s21 = sadd.s32 6, %s1979_s17 }
  0x61   : > { %s480_s23 = sld [smem:[#allocation5 + %s479_s21]] }
  0x67   : > { %s481_s26 = scalar_lea.vmem %s2129_s1, %s480_s23 }
  0x68   : > { %v498_v6 = vld [vmem:[%s481_s26] sm:$0x1] }
  0x69   : > { %499 = vst [vmem:[#allocation2 + $0x6] sm:$0x1] %v498_v6 }
  0x6a   : > { %517 = vsyncadd [#allocation3 + $0x6], 16  ;;  %s518_s27 = sadd.s32 7, %s1979_s17 }
  0x6b   : > { %s519_s9 = sld [smem:[#allocation5 + %s518_s27]] }
  0x71   : > { %s520_s18 = scalar_lea.vmem %s2129_s1, %s519_s9 }
  0x72   : > { %v537_v7 = vld [vmem:[%s520_s18] sm:$0x1] }
  0x73   : > { %538 = vst [vmem:[#allocation2 + $0x7] sm:$0x1] %v537_v7 }
  0x74   : > { %556 = vsyncadd [#allocation3 + $0x7], 16  ;;  %s557_s19 = sadd.s32 8, %s1979_s17 }
  0x75   : > { %s558_s20 = sld [smem:[#allocation5 + %s557_s19]] }
  0x7b   : > { %s559_s23 = scalar_lea.vmem %s2129_s1, %s558_s20 }
  0x7c   : > { %v576_v8 = vld [vmem:[%s559_s23] sm:$0x1] }
  0x7d   : > { %577 = vst [vmem:[#allocation2 + $0x8] sm:$0x1] %v576_v8 }
  0x7e   : > { %595 = vsyncadd [#allocation3 + $0x8], 16  ;;  %s596_s24 = sadd.s32 9, %s1979_s17 }
  0x7f   : > { %s597_s25 = sld [smem:[#allocation5 + %s596_s24]] }
  0x85   : > { %s598_s9 = scalar_lea.vmem %s2129_s1, %s597_s25 }
  0x86   : > { %v615_v9 = vld [vmem:[%s598_s9] sm:$0x1] }
  0x87   : > { %616 = vst [vmem:[#allocation2 + $0x9] sm:$0x1] %v615_v9 }
  0x88   : > { %634 = vsyncadd [#allocation3 + $0x9], 16  ;;  %s635_s11 = sadd.s32 10, %s1979_s17 }
  0x89   : > { %s636_s12 = sld [smem:[#allocation5 + %s635_s11]] }
  0x8f   : > { %s637_s20 = scalar_lea.vmem %s2129_s1, %s636_s12 }
  0x90   : > { %v654_v10 = vld [vmem:[%s637_s20] sm:$0x1] }
  0x91   : > { %655 = vst [vmem:[#allocation2 + $0xa] sm:$0x1] %v654_v10 }
  0x92   : > { %673 = vsyncadd [#allocation3 + $0xa], 16  ;;  %s674_s16 = sadd.s32 11, %s1979_s17 }
  0x93   : > { %s675_s21 = sld [smem:[#allocation5 + %s674_s16]] }
  0x99   : > { %s676_s25 = scalar_lea.vmem %s2129_s1, %s675_s21 }
  0x9a   : > { %v693_v11 = vld [vmem:[%s676_s25] sm:$0x1] }
  0x9b   : > { %694 = vst [vmem:[#allocation2 + $0xb] sm:$0x1] %v693_v11 }
  0x9c   : > { %712 = vsyncadd [#allocation3 + $0xb], 16  ;;  %s713_s26 = sadd.s32 12, %s1979_s17 }
  0x9d   : > { %s714_s27 = sld [smem:[#allocation5 + %s713_s26]] }
  0xa3   : > { %s715_s12 = scalar_lea.vmem %s2129_s1, %s714_s27 }
  0xa4   : > { %v732_v12 = vld [vmem:[%s715_s12] sm:$0x1] }
  0xa5   : > { %733 = vst [vmem:[#allocation2 + $0xc] sm:$0x1] %v732_v12 }
  0xa6   : > { %751 = vsyncadd [#allocation3 + $0xc], 16  ;;  %s752_s18 = sadd.s32 13, %s1979_s17 }
  0xa7   : > { %s753_s19 = sld [smem:[#allocation5 + %s752_s18]] }
  0xad   : > { %s754_s21 = scalar_lea.vmem %s2129_s1, %s753_s19 }
  0xae   : > { %v771_v13 = vld [vmem:[%s754_s21] sm:$0x1] }
  0xaf   : > { %772 = vst [vmem:[#allocation2 + $0xd] sm:$0x1] %v771_v13 }
  0xb0   : > { %790 = vsyncadd [#allocation3 + $0xd], 16  ;;  %s791_s23 = sadd.s32 14, %s1979_s17 }
  0xb1   : > { %s792_s24 = sld [smem:[#allocation5 + %s791_s23]] }
  0xb7   : > { %s793_s27 = scalar_lea.vmem %s2129_s1, %s792_s24 }
  0xb8   : > { %v810_v14 = vld [vmem:[%s793_s27] sm:$0x1] }
  0xb9   : > { %811 = vst [vmem:[#allocation2 + $0xe] sm:$0x1] %v810_v14 }
  0xba   : > { %829 = vsyncadd [#allocation3 + $0xe], 16  ;;  %s830_s9 = sadd.s32 15, %s1979_s17 }
  0xbb   : > { %s831_s11 = sld [smem:[#allocation5 + %s830_s9]] }
  0xc1   : > { %s832_s19 = scalar_lea.vmem %s2129_s1, %s831_s11 }
  0xc2   : > { %v849_v15 = vld [vmem:[%s832_s19] sm:$0x1] }
  0xc3   : > { %850 = vst [vmem:[#allocation2 + $0xf] sm:$0x1] %v849_v15 }
  0xc4   : > { %868 = vsyncadd [#allocation3 + $0xf], 16 }
  0xc5   : > { %1803 = dma.done.wait [#allocation3], 16 }
  0xc6   : > { %1804 = vsyncadd [#allocation3], 4294967280 }
  0xc7   : > { %1805 = dma.done.wait [#allocation3 + $0x1], 16 }
  0xc8   : > { %1806 = vsyncadd [#allocation3 + $0x1], 4294967280 }
  0xc9   : > { %1807 = dma.done.wait [#allocation3 + $0x2], 16 }
  0xca   : > { %1808 = vsyncadd [#allocation3 + $0x2], 4294967280 }
  0xcb   : > { %1809 = dma.done.wait [#allocation3 + $0x3], 16 }
  0xcc   : > { %1810 = vsyncadd [#allocation3 + $0x3], 4294967280 }
  0xcd   : > { %1811 = dma.done.wait [#allocation3 + $0x4], 16 }
  0xce   : > { %1812 = vsyncadd [#allocation3 + $0x4], 4294967280 }
  0xcf   : > { %1813 = dma.done.wait [#allocation3 + $0x5], 16 }
  0xd0   : > { %1814 = vsyncadd [#allocation3 + $0x5], 4294967280 }
  0xd1   : > { %1815 = dma.done.wait [#allocation3 + $0x6], 16 }
  0xd2   : > { %1816 = vsyncadd [#allocation3 + $0x6], 4294967280 }
  0xd3   : > { %1817 = dma.done.wait [#allocation3 + $0x7], 16 }
  0xd4   : > { %1818 = vsyncadd [#allocation3 + $0x7], 4294967280 }
  0xd5   : > { %1819 = dma.done.wait [#allocation3 + $0x8], 16 }
  0xd6   : > { %1820 = vsyncadd [#allocation3 + $0x8], 4294967280 }
  0xd7   : > { %1821 = dma.done.wait [#allocation3 + $0x9], 16 }
  0xd8   : > { %1822 = vsyncadd [#allocation3 + $0x9], 4294967280 }
  0xd9   : > { %1823 = dma.done.wait [#allocation3 + $0xa], 16 }
  0xda   : > { %1824 = vsyncadd [#allocation3 + $0xa], 4294967280 }
  0xdb   : > { %1825 = dma.done.wait [#allocation3 + $0xb], 16 }
  0xdc   : > { %1826 = vsyncadd [#allocation3 + $0xb], 4294967280 }
  0xdd   : > { %1827 = dma.done.wait [#allocation3 + $0xc], 16 }
  0xde   : > { %1828 = vsyncadd [#allocation3 + $0xc], 4294967280 }
  0xdf   : > { %1829 = dma.done.wait [#allocation3 + $0xd], 16 }
  0xe0   : > { %1830 = vsyncadd [#allocation3 + $0xd], 4294967280 }
  0xe1   : > { %1831 = dma.done.wait [#allocation3 + $0xe], 16 }
  0xe2   : > { %1832 = vsyncadd [#allocation3 + $0xe], 4294967280 }
  0xe3   : > { %1833 = dma.done.wait [#allocation3 + $0xf], 16 }
  0xe4   : > { %1834 = vsyncadd [#allocation3 + $0xf], 4294967280  ;;  %v910_v16 = vlaneseq  ;;  %v1594_v18 = vld [vmem:[%s2130_s2 + $0x8] sm:$0xff]  ;;  %v1596_v19 = vld [vmem:[%s2130_s2 + $0x18] sm:$0xff]  ;;  %vm933_vm2 = vcmask 261120   ;;  %s1214_s11 = scalar_lea.hbm %s2135_s7, %s1926_s0  ;;  %s1216_s19 = sshll.u32 %s1988_s22, 4  ;;  %s1217_s19 = int_to_ptr.vmem [resolvable:$true] %s1216_s19 }
  0xe5   : > { %v901_v20 = vld [vmem:[#allocation2] sm:$0xff]  ;;  %v902_v21 = vld [vmem:[#allocation2 + $0x8] sm:$0xff]  ;;  %972 = vmatpush.bf16.msra.mxu2 %v1594_v18  ;;  %943 = vmatpush.bf16.msra.mxu0 %v1596_v19  ;;  %v1595_v23 = vld [vmem:[%s2130_s2 + $0x10] sm:$0xff]  ;;  %s1218_s17 = sshll.u32 %s1214_s11, 4  ;;  %s2140_s20 = sand.u32 1, %s1845_s29   ;;  %s1219_s17 = int_to_ptr.hbm [resolvable:$true] %s1218_s17 }
  0xe6   : > { %v911_v17 = vshrl.u32 %v910_v16, 7  ;;  %v1593_v22 = vld [vmem:[%s2130_s2] sm:$0xff]  ;;  %v908_v24 = vrot.slane %v901_v20, 1  ;;  %v909_v25 = vrot.slane %v902_v21, 1  ;;  %v1600_v26 = vld [vmem:[%s2130_s2 + $0x38] sm:$0xff]  ;;  %v1022_v27 = vrot.slane %v901_v20, 3 }
  0xe7   : > { %v1598_v28 = vld [vmem:[%s2130_s2 + $0x28] sm:$0xff]  ;;  %v1023_v29 = vrot.slane %v902_v21, 3  ;;  %1054 = vmatpush.bf16.msra.mxu3 %v1600_v26  ;;  %v1599_v33 = vld [vmem:[%s2130_s2 + $0x30] sm:$0xff]  ;;  %v903_v34 = vpack.c.bf16 %v902_v21, %v901_v20  ;;  %v1597_v38 = vld [vmem:[%s2130_s2 + $0x20] sm:$0xff]  ;;  %v980_v41 = vrot.slane %v901_v20, 2  ;;  %v981_v42 = vrot.slane %v902_v21, 2 }
  0xe8   : > { %vm912_vm0 = vcmp.lt.s32.totalorder %v911_v17, 7  ;;  %vm1024_vm1 = vcmp.lt.s32.totalorder %v911_v17, 5  ;;  %v1602_v30 = vld [vmem:[%s2130_s2 + $0x48] sm:$0xff]  ;;  %v1601_v40 = vld [vmem:[%s2130_s2 + $0x40] sm:$0xff]  ;;  %v1064_v43 = vrot.slane %v901_v20, 4  ;;  %v1065_v44 = vrot.slane %v902_v21, 4 }
  0xe9   : > { %v913_v31 = vsel %vm912_vm0, %v908_v24, %v909_v25  ;;  %v914_v32 = vsel %vm912_vm0, %v909_v25, %v908_v24  ;;  %v1025_v36 = vsel %vm1024_vm1, %v1022_v27, %v1023_v29  ;;  %v1026_v37 = vsel %vm1024_vm1, %v1023_v29, %v1022_v27  ;;  %973 = vmatpush.bf16.msra.mxu2 %v1593_v22  ;;  %v1610_v51 = vld [vmem:[#allocation9 + $0x38] sm:$0xff]  ;;  %v1609_v52 = vld [vmem:[#allocation9 + $0x30] sm:$0xff]  ;;  %v1608_v53 = vld [vmem:[#allocation9 + $0x28] sm:$0xff]  ;;  %s1206_s16 = scalar_lea.sflag [#allocation8], %s2140_s20  ;;  %s1763_s21 = sshra.s32 %s1219_s17, 4  ;;  %s1764_s21 = int_to_ptr.hbm [resolvable:$true] %s1763_s21 }
  0xea   : > { %v915_v35 = vpack.c.bf16 %v914_v32, %v913_v31  ;;  %944 = vmatpush.bf16.msra.mxu0 %v1595_v23  ;;  %v1027_v39 = vpack.c.bf16 %v1026_v37, %v1025_v36  ;;  %vm982_vm3 = vcmp.lt.s32.totalorder %v911_v17, 6  ;;  %vm1066_vm4 = vcmp.lt.s32.totalorder %v911_v17, 4  ;;  %1191 = vmatpush.bf16.msra.mxu1 %v1610_v51  ;;  %v1607_v56 = vld [vmem:[#allocation9 + $0x20] sm:$0xff]  ;;  %v1606_v57 = vld [vmem:[#allocation9 + $0x18] sm:$0xff]  ;;  %v1605_v58 = vld [vmem:[#allocation9 + $0x10] sm:$0xff]  ;;  %s1765_s23 = scalar_lea.hbm %s1764_s21, 1  ;;  %p1770_p2 = scmp.lt.s32.totalorder %s1764_s21, %s2135_s7 }
  0xeb   : > { %1055 = vmatpush.bf16.msra.mxu3 %v1599_v33  ;;  %v983_v45 = vsel %vm982_vm3, %v980_v41, %v981_v42  ;;  %v984_v46 = vsel %vm982_vm3, %v981_v42, %v980_v41  ;;  %v1067_v47 = vsel %vm1066_vm4, %v1064_v43, %v1065_v44  ;;  %v1068_v48 = vsel %vm1066_vm4, %v1065_v44, %v1064_v43  ;;  %v1604_v61 = vld [vmem:[#allocation9 + $0x8] sm:$0xff]  ;;  %v1603_v62 = vld [vmem:[#allocation9] sm:$0xff]  ;;  %v1114_v17 = vld [vmem:[#allocation6] sm:$0xff]  ;;  %p1766_p13 = scmp.ne.s32.totalorder %s1764_s21, %s1765_s23  ;;  %s1769_s25 = scalar_lea.hbm %s2135_s7, 2 }
  0xec   : > { %1503 = vmatmul.msk.bf16.vlgmr.msra.gmra.mxu2 %vm933_vm2, %v903_v34  ;;  %v985_v49 = vpack.c.bf16 %v984_v46, %v983_v45  ;;  %v1069_v50 = vpack.c.bf16 %v1068_v48, %v1067_v47  ;;  %v1676_v7 = vld [vmem:[%s2131_s3] ss:$0 sm:$0xff]  ;;  %v1115_v18 = vld [vmem:[#allocation6 + $0x8] sm:$0xff]  ;;  %p1771_p3 = scmp.lt.s32.totalorder %s1769_s25, %s1765_s23 }
  0xed   : > { %1012 = vmatpush.bf16.msrb.mxu2 %v1598_v28  ;;  %1494 = vmatmul.msk.bf16.vlgmr.msra.gmra.mxu0 %vm933_vm2, %v915_v35  ;;  %p1767_p0 = pnand %p1766_p13, %p1943_p5 }
  0xee   : > { %1096 = vmatpush.bf16.msrb.mxu0 %v1602_v30  ;;  %1529 = vmatmul.msk.bf16.vlgmr.msra.gmra.mxu3 %vm933_vm2, %v1027_v39  ;;  %v1142_v30 = vld [vmem:[%s2134_s6] sm:$0x1]  ;;  %p1772_p4 = por %p1771_p3, %p1770_p2 }
  0xef   : > { %1192 = vmatpush.bf16.msra.mxu1 %v1609_v52  ;;  %p1768_p1 = pneg %p1767_p0 }
  0xf1   : > { %1013 = vmatpush.bf16.msrb.mxu2 %v1597_v38  ;;  %p1773_p7 = pnand %p1772_p4, %p1768_p1 }
  0xf2   : > { %1097 = vmatpush.bf16.msrb.mxu0 %v1601_v40 }
  0xf3   : > { %1193 = vmatpush.bf16.msra.mxu1 %v1608_v53 }
  0xf7   : > { %1194 = vmatpush.bf16.msra.mxu1 %v1607_v56 }
  0xfb   : > { %1195 = vmatpush.bf16.msra.mxu1 %v1606_v57 }
  0xfc   : > { %1516 = vmatmul.msk.bf16.vlgmr.msrb.gmra.mxu2 %vm933_vm2, %v985_v49 }
  0xfd   : > { %1542 = vmatmul.msk.bf16.vlgmr.msrb.gmra.mxu0 %vm933_vm2, %v1069_v50 }
  0xff   : > { %1196 = vmatpush.bf16.msra.mxu1 %v1605_v58 }
 0x103   : > { %1197 = vmatpush.bf16.msra.mxu1 %v1604_v61 }
 0x107   : > { %1198 = vmatpush.bf16.msra.mxu1 %v1603_v62 }
 0x16a   : > { %v946_v54 = vpop.f32.mrf.mxu0 }
 0x16f   : > { %v975_v55 = vpop.f32.mrf.mxu2 }
 0x170   : > { %v976_v63 = vadd.f32 %v975_v55, %v946_v54 }
 0x171   : > { %v1057_v0 = vpop.f32.mrf.mxu3 }
 0x172   : > { %v948_v59 = vpop.f32.mrf.mxu0 }
 0x177   : > { %v977_v60 = vpop.f32.mrf.mxu2 }
 0x178   : > { %v978_v5 = vadd.f32 %v977_v60, %v948_v59 }
 0x179   : > { %v1059_v10 = vpop.f32.mrf.mxu3 }
 0x17a   : > { %v1099_v3 = vpop.f32.mrf.mxu0 }
 0x17f   : > { %v1015_v1 = vpop.f32.mrf.mxu2 }
 0x180   : > { %v1020_v2 = vadd.f32 %v1015_v1, %v976_v63 }
 0x182   : > { %v1062_v4 = vadd.f32 %v1057_v0, %v1020_v2  ;;  %v1101_v13 = vpop.f32.mrf.mxu0 }
 0x184   : > { %v1104_v6 = vadd.f32 %v1099_v3, %v1062_v4 }
 0x186   : > { %v1110_v11 = vadd.f32 %v1676_v7, %v1104_v6 }
 0x187   : > { %v1017_v8 = vpop.f32.mrf.mxu2 }
 0x188   : > { %v1021_v9 = vadd.f32 %v1017_v8, %v978_v5  ;;  %v1112_v15 = vmax.f32 %v1110_v11, 0.0 }
 0x18a   : > { %v1063_v12 = vadd.f32 %v1059_v10, %v1021_v9  ;;  %v1116_v20 = vadd.f32 %v1114_v17, %v1112_v15 }
 0x18c   : > { %v1105_v14 = vadd.f32 %v1101_v13, %v1063_v12 }
 0x18e   : > { %v1111_v16 = vadd.f32 %v1676_v7, %v1105_v14 }
 0x190   : > { %v1113_v19 = vmax.f32 %v1111_v16, 0.0 }
 0x192   : > { %v1117_v21 = vadd.f32 %v1115_v18, %v1113_v19 }
 0x194   : > { %v1118_v22 = vmax.f32 %v1116_v20, %v1117_v21 }
 0x196   : > { %v1119_v23 = vrot.slane %v1118_v22, 4 }
 0x198   : > { %v1120_v24 = vmax.f32 %v1118_v22, %v1119_v23 }
 0x19a   : > { %v1121_v25 = vrot.slane %v1120_v24, 2 }
 0x19c   : > { %v1122_v26 = vmax.f32 %v1120_v24, %v1121_v25 }
 0x19e   : > { %v1123_v27 = vrot.slane %v1122_v26, 1 }
 0x1a0   : > { %v1124_v28 = vmax.f32 %v1122_v26, %v1123_v27 }
 0x1a2   : > { %v1125_v29 = vpack.c.bf16 %v1124_v28, %v1124_v28 }
 0x1a4   : > { %1199 = vmatmul.bf16.vlgmr.msra.gmra.mxu1 %v1125_v29 }
 0x221   : > { %v1200_v31 = vpop.f32.mrf.mxu1 }
 0x222   : > { %v1201_v32 = vadd.f32 %v1200_v31, %v1142_v30 }
 0x224   : > { %1204 = vst [vmem:[%s1988_s22] sm:$0x1] %v1201_v32 }
 0x225   : > { %1776 = shalt.err (!%p1773_p7)
}
 0x226   : > { %1619 = dma.vmem_to_hbm [thread:$0]  (%p1943_p5), %s1217_s19, 16, %s1219_s17, %s1206_s16  }
 0x229   : > { %v1202_v33 = vpop.f32.mrf.mxu1 }
 0x22a PF: > { %p1636_p8 = scmp.ge.s32.totalorder %s1853_s8, 2  ;;  %s1230_s22 = sand.u32 1, %s1841_s28  }
 0x22b   : > { %s1231_s9 = scalar_lea.sflag [#allocation8], %s1230_s22 }
 0x22c   : > { %p1629_p9 = pnand %p1636_p8, %p1947_p6 }
 0x22e   : > { %p1630_p10 = pneg %p1629_p9 }
 0x230   : > { %1836 = dma.done.wait (%p1630_p10), %s1231_s9, 16  }
 0x231   : > { %1838 = vsyncadd (%p1630_p10), %s1231_s9, 4294967280  ;;  %p27_p11 = scmp.ge.s32.totalorder %s1930_s10, 4   ;;  %s2141_s28 = smov %s1845_s29 }
 0x232   : > { %s2142_s29 = smov %s1849_s30  ;;  %s2143_s30 = smov %s1941_s13 }
 0x233   : > { %s2144_s8 = smov %s1930_s10  ;;  %29 = sbr.rel (!%p27_p11) target bundleno = 11 (0xb), region = 690 }
 0x238   :  { %1236 = vsyncpa [#allocation7], 1 }
 0x239   :  { %1238 = vsyncpa [#allocation7 + $0x1], 1 }
 0x23a   :  { %1239 = vsyncpa [#allocation10], 1 }
 0x23b   :  { %1240 = vsyncpa [#allocation8], 1 }
 0x23c   :  { %1242 = vsyncpa [#allocation8 + $0x1], 1 }
 0x23d   :  { %1243 = vsyncmov [#allocation3] }
 0x240   :  { %s1244_s8 = vpop.sfrf %1243 }
 0x241   :  { %p1577_p5 = scmp.ne.s32.totalorder %s1244_s8, 0 }
 0x243   :  { %1248 = shalt.err (%p1577_p5)  }
 0x244   :  { %1250 = vsyncmov [#allocation3 + $0x1] }
 0x247   :  { %s1251_s14 = vpop.sfrf %1250 }
 0x248   :  { %p1578_p6 = scmp.ne.s32.totalorder %s1251_s14, 0 }
 0x24a   :  { %1255 = shalt.err (%p1578_p6)  }
 0x24b   :  { %1257 = vsyncmov [#allocation3 + $0x2] }
 0x24e   :  { %s1258_s15 = vpop.sfrf %1257 }
 0x24f   :  { %p1579_p12 = scmp.ne.s32.totalorder %s1258_s15, 0 }
 0x251   :  { %1262 = shalt.err (%p1579_p12)  }
 0x252   :  { %1264 = vsyncmov [#allocation3 + $0x3] }
 0x255   :  { %s1265_s10 = vpop.sfrf %1264 }
 0x256   :  { %p1580_p13 = scmp.ne.s32.totalorder %s1265_s10, 0 }
 0x258   :  { %1269 = shalt.err (%p1580_p13)  }
 0x259   :  { %1271 = vsyncmov [#allocation3 + $0x4] }
 0x25c   :  { %s1272_s1 = vpop.sfrf %1271 }
 0x25d   :  { %p1581_p0 = scmp.ne.s32.totalorder %s1272_s1, 0 }
 0x25f   :  { %1276 = shalt.err (%p1581_p0)  }
 0x260   :  { %1278 = vsyncmov [#allocation3 + $0x5] }
 0x263   :  { %s1279_s2 = vpop.sfrf %1278 }
 0x264   :  { %p1582_p1 = scmp.ne.s32.totalorder %s1279_s2, 0 }
 0x266   :  { %1283 = shalt.err (%p1582_p1)  }
 0x267   :  { %1285 = vsyncmov [#allocation3 + $0x6] }
 0x26a   :  { %s1286_s3 = vpop.sfrf %1285 }
 0x26b   :  { %p1583_p2 = scmp.ne.s32.totalorder %s1286_s3, 0 }
 0x26d   :  { %1290 = shalt.err (%p1583_p2)  }
 0x26e   :  { %1292 = vsyncmov [#allocation3 + $0x7] }
 0x271   :  { %s1293_s4 = vpop.sfrf %1292 }
 0x272   :  { %p1584_p3 = scmp.ne.s32.totalorder %s1293_s4, 0 }
 0x274   :  { %1297 = shalt.err (%p1584_p3)  }
 0x275   :  { %1299 = vsyncmov [#allocation3 + $0x8] }
 0x278   :  { %s1300_s5 = vpop.sfrf %1299 }
 0x279   :  { %p1585_p4 = scmp.ne.s32.totalorder %s1300_s5, 0 }
 0x27b   :  { %1304 = shalt.err (%p1585_p4)  }
 0x27c   :  { %1306 = vsyncmov [#allocation3 + $0x9] }
 0x27f   :  { %s1307_s6 = vpop.sfrf %1306 }
 0x280   :  { %p1586_p7 = scmp.ne.s32.totalorder %s1307_s6, 0 }
 0x282   :  { %1311 = shalt.err (%p1586_p7)  }
 0x283   :  { %1313 = vsyncmov [#allocation3 + $0xa] }
 0x286   :  { %s1314_s7 = vpop.sfrf %1313 }
 0x287   :  { %p1587_p8 = scmp.ne.s32.totalorder %s1314_s7, 0 }
 0x289   :  { %1318 = shalt.err (%p1587_p8)  }
 0x28a   :  { %1320 = vsyncmov [#allocation3 + $0xb] }
 0x28d   :  { %s1321_s28 = vpop.sfrf %1320 }
 0x28e   :  { %p1588_p9 = scmp.ne.s32.totalorder %s1321_s28, 0 }
 0x290   :  { %1325 = shalt.err (%p1588_p9)  }
 0x291   :  { %1327 = vsyncmov [#allocation3 + $0xc] }
 0x294   :  { %s1328_s29 = vpop.sfrf %1327 }
 0x295   :  { %p1589_p10 = scmp.ne.s32.totalorder %s1328_s29, 0 }
 0x297   :  { %1332 = shalt.err (%p1589_p10)  }
 0x298   :  { %1334 = vsyncmov [#allocation3 + $0xd] }
 0x29b   :  { %s1335_s30 = vpop.sfrf %1334 }
 0x29c   :  { %p1590_p11 = scmp.ne.s32.totalorder %s1335_s30, 0 }
 0x29e   :  { %1339 = shalt.err (%p1590_p11)  }
 0x29f   :  { %1341 = vsyncmov [#allocation3 + $0xe] }
 0x2a2   :  { %s1342_s13 = vpop.sfrf %1341 }
 0x2a3   :  { %p1591_p5 = scmp.ne.s32.totalorder %s1342_s13, 0 }
 0x2a5   :  { %1346 = shalt.err (%p1591_p5)  }
 0x2a6   :  { %1348 = vsyncmov [#allocation3 + $0xf] }
 0x2a9   :  { %s1349_s11 = vpop.sfrf %1348 }
 0x2aa   :  { %p1592_p6 = scmp.ne.s32.totalorder %s1349_s11, 0 }
 0x2ac   :  { %1353 = shalt.err (%p1592_p6)  }

</bundles_post_ra>
